<compile_context>
chip_gen: v5e
topology: v5e:2x2
jax: 0.10.0
libtpu: 0.0.40
codegen_flags: <defaults>
</compile_context>

<pallas_src>
import jax
import jax.numpy as jnp
import numpy as np
from jax import lax
from jax.experimental import pallas as pl
from jax.experimental.pallas import tpu as pltpu


# ----------------------------- kernel ---------------------------------------

def _make_kernel(H, W):
    HW = H * W
    GUARD = 1                       # one guard lane on each end of the flat buffer
    PLEN = (H + 2) * W + 2 * GUARD  # row-padded flattened length

    def kernel(L_ref, R_ref, w_in_ref, b_in_ref, w1_ref, b1_ref,
               w2_ref, b2_ref, out_ref, xrp, frp):
        f32 = jnp.float32

        # Lane masks for the image's left / right columns (reflect handling).
        col = lax.broadcasted_iota(jnp.int32, (1, HW), 1) % W
        left = col == 0
        right = col == (W - 1)

        def reflect_rows_and_guards(rp):
            # padded row 0  <- original row 1   (PyTorch 'reflect')
            rp[:, GUARD:GUARD + W] = rp[:, GUARD + 2 * W:GUARD + 3 * W]
            # padded row H+1 <- original row H-2
            rp[:, GUARD + (H + 1) * W:GUARD + (H + 2) * W] = (
                rp[:, GUARD + (H - 1) * W:GUARD + H * W])
            z = jnp.zeros((rp.shape[0], GUARD), f32)
            rp[:, 0:GUARD] = z
            rp[:, PLEN - GUARD:PLEN] = z

        def im2col(rp):
            # Build (9*Cin, H*W) patches; taps ordered (kh, kw), channel minor.
            pieces = []
            for kh in range(3):
                for dj in (-1, 0, 1):          # dj = kw - 1 (column shift)
                    s = GUARD + kh * W + dj
                    v = rp[:, s:s + HW]
                    if dj == -1:               # left edge -> reflect column 1
                        v = jnp.where(left, rp[:, s + 2:s + 2 + HW], v)
                    elif dj == 1:              # right edge -> reflect column W-2
                        v = jnp.where(right, rp[:, s - 2:s - 2 + HW], v)
                    pieces.append(v)
            return jnp.concatenate(pieces, axis=0)

        # ---- fused conv_L (1->8) + conv_R (3->8) + channel concat -----------
        # 4-channel row-padded input assembled in VMEM scratch (channel 0 = L).
        xrp[0:1, GUARD + W:GUARD + W + HW] = L_ref[...]
        xrp[1:4, GUARD + W:GUARD + W + HW] = R_ref[...]
        reflect_rows_and_guards(xrp)

        feat = jnp.dot(w_in_ref[...], im2col(xrp),
                       preferred_element_type=jnp.float32) + b_in_ref[...]

        # ---- out_convs[0]: 16 -> 16, 3x3 reflect, then ReLU ------------------
        frp[:, GUARD + W:GUARD + W + HW] = feat
        reflect_rows_and_guards(frp)

        y = jnp.dot(w1_ref[...], im2col(frp),
                    preferred_element_type=jnp.float32) + b1_ref[...]
        y = jnp.maximum(y, 0.0)

        # ---- out_convs[2]: 1x1 conv 16 -> 1 as channel reduction, sigmoid ----
        z = jnp.sum(y * w2_ref[...], axis=0, keepdims=True) + b2_ref[...]
        out_ref[...] = jax.nn.sigmoid(z)

    return kernel, PLEN


# ----------------------------- wrapper ---------------------------------------

@jax.jit
def overexposure_forward(L_nchw, R_nchw, params):
    """L: (N,1,H,W), R: (N,3,H,W) float32 NCHW.  Returns (N,1,H,W)."""
    wL, bL, wR, bR, w1, b1, w2, b2 = params
    N, _, H, W = L_nchw.shape
    HW = H * W
    f32 = jnp.float32

    # Fuse conv_L and conv_R into one 4-channel conv (block-diagonal weight),
    # flatten 3x3 weights to (Cout, 9*Cin) with tap-major / channel-minor order.
    w_in = jnp.concatenate(
        [jnp.concatenate([wL, jnp.zeros((8, 3, 3, 3), f32)], axis=1),
         jnp.concatenate([jnp.zeros((8, 1, 3, 3), f32), wR], axis=1)],
        axis=0)                                                  # (16, 4, 3, 3)
    w_in_flat = jnp.transpose(w_in, (0, 2, 3, 1)).reshape(16, 36)
    b_in = jnp.concatenate([bL, bR]).reshape(16, 1)
    w1_flat = jnp.transpose(w1, (0, 2, 3, 1)).reshape(16, 144)
    b1c = b1.reshape(16, 1)
    w2c = w2.reshape(16, 1)
    b2c = b2.reshape(1, 1)

    # Free reshapes in HBM: keep native NCHW layout, flatten spatial to lanes.
    Lf = L_nchw.reshape(N, 1, HW).astype(f32)
    Rf = R_nchw.reshape(N, 3, HW).astype(f32)

    kernel, PLEN = _make_kernel(H, W)

    out_flat = pl.pallas_call(
        kernel,
        out_shape=jax.ShapeDtypeStruct((N, 1, HW), f32),
        grid=(N,),
        in_specs=[
            pl.BlockSpec((None, 1, HW), lambda n: (n, 0, 0)),
            pl.BlockSpec((None, 3, HW), lambda n: (n, 0, 0)),
            pl.BlockSpec((16, 36), lambda n: (0, 0)),
            pl.BlockSpec((16, 1), lambda n: (0, 0)),
            pl.BlockSpec((16, 144), lambda n: (0, 0)),
            pl.BlockSpec((16, 1), lambda n: (0, 0)),
            pl.BlockSpec((16, 1), lambda n: (0, 0)),
            pl.BlockSpec((1, 1), lambda n: (0, 0)),
        ],
        out_specs=pl.BlockSpec((None, 1, HW), lambda n: (n, 0, 0)),
        scratch_shapes=[
            pltpu.VMEM((4, PLEN), f32),    # row-padded 4-channel input
            pltpu.VMEM((16, PLEN), f32),   # row-padded 16-channel features
        ],
        compiler_params=pltpu.CompilerParams(
            dimension_semantics=("parallel",),
            vmem_limit_bytes=32 * 1024 * 1024),
    )(Lf, Rf, w_in_flat, b_in, w1_flat, b1c, w2c, b2c)

    return out_flat.reshape(N, 1, H, W)


# ----------------------------- reference (pure JAX) ---------------------------

def overexposure_reference(L, R, params):
    wL, bL, wR, bR, w1, b1, w2, b2 = params

    def conv3x3(x, w, b):
        xp = jnp.pad(x, ((0, 0), (0, 0), (1, 1), (1, 1)), mode="reflect")
        y = lax.conv_general_dilated(
            xp, w, (1, 1), "VALID",
            dimension_numbers=("NCHW", "OIHW", "NCHW"))
        return y + b.reshape(1, -1, 1, 1)

    x1 = conv3x3(L, wL, bL)
    x2 = conv3x3(R, wR, bR)
    x = jnp.concatenate([x1, x2], axis=1)
    y = jax.nn.relu(conv3x3(x, w1, b1))
    z = jnp.einsum("nchw,oc->nohw", y, w2.reshape(1, 16)) + b2.reshape(1, 1, 1, 1)
    return jax.nn.sigmoid(z)


# ----------------------------- main -------------------------------------------

def make_params(key):
    ks = jax.random.split(key, 8)
    s = 0.1
    f32 = jnp.float32
    wL = s * jax.random.normal(ks[0], (8, 1, 3, 3), f32)    # conv_L
    bL = s * jax.random.normal(ks[1], (8,), f32)
    wR = s * jax.random.normal(ks[2], (8, 3, 3, 3), f32)    # conv_R
    bR = s * jax.random.normal(ks[3], (8,), f32)
    w1 = s * jax.random.normal(ks[4], (16, 16, 3, 3), f32)  # out_convs[0]
    b1 = s * jax.random.normal(ks[5], (16,), f32)
    w2 = s * jax.random.normal(ks[6], (1, 16, 1, 1), f32)   # out_convs[2]
    b2 = s * jax.random.normal(ks[7], (1,), f32)
    return (wL, bL, wR, bR, w1, b1, w2, b2)


if __name__ == "__main__":
    key = jax.random.PRNGKey(0)
    k_param, k_L, k_R = jax.random.split(key, 3)

    N, H, W = 2, 16, 16
    L = jax.random.uniform(k_L, (N, 1, H, W), jnp.float32)   # NCHW, like PyTorch
    R = jax.random.uniform(k_R, (N, 3, H, W), jnp.float32)
    params = make_params(k_param)

    out = jax.block_until_ready(overexposure_forward(L, R, params))
    ref = jax.block_until_ready(overexposure_reference(L, R, params))

    np.testing.assert_allclose(np.asarray(out), np.asarray(ref),
                               atol=2e-4, rtol=2e-4)
    assert out.shape == (N, 1, H, W)
    print("KERNEL_OK")
</pallas_src>

<mosaic_0001>
module attributes {stable_mosaic.version = 11 : i64} {
  func.func @kernel(%arg0: i32, %arg1: memref<1x1x256xf32, #tpu.memory_space<vmem>>, %arg2: memref<1x3x256xf32, #tpu.memory_space<vmem>>, %arg3: memref<16x36xf32, #tpu.memory_space<vmem>>, %arg4: memref<16x1xf32, #tpu.memory_space<vmem>>, %arg5: memref<16x144xf32, #tpu.memory_space<vmem>>, %arg6: memref<16x1xf32, #tpu.memory_space<vmem>>, %arg7: memref<16x1xf32, #tpu.memory_space<vmem>>, %arg8: memref<1x1xf32, #tpu.memory_space<vmem>>, %arg9: memref<1x1x256xf32, #tpu.memory_space<vmem>>, %arg10: memref<4x290xf32, #tpu.memory_space<vmem>>, %arg11: memref<16x290xf32, #tpu.memory_space<vmem>>) attributes {dimension_semantics = [#tpu.dimension_semantics<parallel>], iteration_bounds = array<i64: 2>, scalar_prefetch = 0 : i64, scratch_operands = 2 : i64, tpu.core_type = #tpu.core_type<tc>, window_params = [{transform_indices = @transform_0, window_bounds = array<i64: 1, 1, 256>}, {transform_indices = @transform_1, window_bounds = array<i64: 1, 3, 256>}, {pipeline_mode = #tpu.pipeline_mode<synchronous>, transform_indices = @transform_2, window_bounds = array<i64: 16, 36>}, {pipeline_mode = #tpu.pipeline_mode<synchronous>, transform_indices = @transform_3, window_bounds = array<i64: 16, 1>}, {pipeline_mode = #tpu.pipeline_mode<synchronous>, transform_indices = @transform_4, window_bounds = array<i64: 16, 144>}, {pipeline_mode = #tpu.pipeline_mode<synchronous>, transform_indices = @transform_5, window_bounds = array<i64: 16, 1>}, {pipeline_mode = #tpu.pipeline_mode<synchronous>, transform_indices = @transform_6, window_bounds = array<i64: 16, 1>}, {pipeline_mode = #tpu.pipeline_mode<synchronous>, transform_indices = @transform_7, window_bounds = array<i64: 1, 1>}, {transform_indices = @transform_8, window_bounds = array<i64: 1, 1, 256>}]} {
    %0 = tpu.iota {dimensions = array<i32: 1>} : vector<1x256xi32>
    %c16_i32 = arith.constant 16 : i32
    %c0_i32 = arith.constant 0 : i32
    %1 = arith.cmpi eq, %c16_i32, %c0_i32 : i32
    %c1_i32 = arith.constant 1 : i32
    %2 = arith.select %1, %c1_i32, %c16_i32 : i32
    %3 = vector.broadcast %2 : i32 to vector<1x256xi32>
    %4 = arith.remsi %0, %3 : vector<1x256xi32>
    %c0_i32_0 = arith.constant 0 : i32
    %5 = vector.broadcast %c0_i32_0 : i32 to vector<1x256xi32>
    %6 = arith.cmpi ne, %4, %5 : vector<1x256xi32>
    %c0_i32_1 = arith.constant 0 : i32
    %7 = vector.broadcast %c0_i32_1 : i32 to vector<1x256xi32>
    %8 = arith.cmpi slt, %4, %7 : vector<1x256xi32>
    %c0_i32_2 = arith.constant 0 : i32
    %9 = arith.cmpi slt, %2, %c0_i32_2 : i32
    %10 = vector.broadcast %9 : i1 to vector<1x256xi1>
    %11 = vector.broadcast %10 : vector<1x256xi1> to vector<1x256xi1>
    %12 = arith.xori %8, %11 : vector<1x256xi1>
    %13 = arith.andi %12, %6 : vector<1x256xi1>
    %14 = vector.broadcast %2 : i32 to vector<1x256xi32>
    %15 = arith.addi %4, %14 : vector<1x256xi32>
    %16 = arith.select %13, %15, %4 : vector<1x256xi1>, vector<1x256xi32>
    %c0_i32_3 = arith.constant 0 : i32
    %17 = vector.broadcast %c0_i32_3 : i32 to vector<1x256xi32>
    %18 = arith.cmpi eq, %16, %17 : vector<1x256xi32>
    %c15_i32 = arith.constant 15 : i32
    %19 = vector.broadcast %c15_i32 : i32 to vector<1x256xi32>
    %20 = arith.cmpi eq, %16, %19 : vector<1x256xi32>
    %c0 = arith.constant 0 : index
    %c0_4 = arith.constant 0 : index
    %c0_5 = arith.constant 0 : index
    %21 = vector.load %arg1[%c0, %c0_4, %c0_5] : memref<1x1x256xf32, #tpu.memory_space<vmem>>, vector<1x1x256xf32>
    %22 = vector.shape_cast %21 : vector<1x1x256xf32> to vector<1x256xf32>
    %c0_6 = arith.constant 0 : index
    %c17 = arith.constant 17 : index
    %23 = vector.load %arg10[%c0_6, %c17] : memref<4x290xf32, #tpu.memory_space<vmem>>, vector<1x256xf32>
    tpu.vector_store %arg10[%c0_6, %c17], %22 {strides = array<i32>} : memref<4x290xf32, #tpu.memory_space<vmem>>, vector<1x256xf32>,
    %c0_7 = arith.constant 0 : index
    %c0_8 = arith.constant 0 : index
    %c0_9 = arith.constant 0 : index
    %24 = vector.load %arg2[%c0_7, %c0_8, %c0_9] : memref<1x3x256xf32, #tpu.memory_space<vmem>>, vector<1x3x256xf32>
    %25 = vector.shape_cast %24 : vector<1x3x256xf32> to vector<3x256xf32>
    %c1 = arith.constant 1 : index
    %c17_10 = arith.constant 17 : index
    %26 = vector.load %arg10[%c1, %c17_10] : memref<4x290xf32, #tpu.memory_space<vmem>>, vector<3x256xf32>
    tpu.vector_store %arg10[%c1, %c17_10], %25 {strides = array<i32>} : memref<4x290xf32, #tpu.memory_space<vmem>>, vector<3x256xf32>,
    %c0_11 = arith.constant 0 : index
    %c33 = arith.constant 33 : index
    %27 = vector.load %arg10[%c0_11, %c33] : memref<4x290xf32, #tpu.memory_space<vmem>>, vector<4x16xf32>
    %c0_12 = arith.constant 0 : index
    %c1_13 = arith.constant 1 : index
    %28 = vector.load %arg10[%c0_12, %c1_13] : memref<4x290xf32, #tpu.memory_space<vmem>>, vector<4x16xf32>
    tpu.vector_store %arg10[%c0_12, %c1_13], %27 {strides = array<i32>} : memref<4x290xf32, #tpu.memory_space<vmem>>, vector<4x16xf32>,
    %c0_14 = arith.constant 0 : index
    %c241 = arith.constant 241 : index
    %29 = vector.load %arg10[%c0_14, %c241] : memref<4x290xf32, #tpu.memory_space<vmem>>, vector<4x16xf32>
    %c0_15 = arith.constant 0 : index
    %c273 = arith.constant 273 : index
    %30 = vector.load %arg10[%c0_15, %c273] : memref<4x290xf32, #tpu.memory_space<vmem>>, vector<4x16xf32>
    tpu.vector_store %arg10[%c0_15, %c273], %29 {strides = array<i32>} : memref<4x290xf32, #tpu.memory_space<vmem>>, vector<4x16xf32>,
    %cst = arith.constant 0.000000e+00 : f32
    %31 = vector.broadcast %cst : f32 to vector<4x1xf32>
    %c0_16 = arith.constant 0 : index
    %c0_17 = arith.constant 0 : index
    %32 = vector.load %arg10[%c0_16, %c0_17] : memref<4x290xf32, #tpu.memory_space<vmem>>, vector<4x1xf32>
    tpu.vector_store %arg10[%c0_16, %c0_17], %31 {strides = array<i32>} : memref<4x290xf32, #tpu.memory_space<vmem>>, vector<4x1xf32>,
    %c0_18 = arith.constant 0 : index
    %c289 = arith.constant 289 : index
    %33 = vector.load %arg10[%c0_18, %c289] : memref<4x290xf32, #tpu.memory_space<vmem>>, vector<4x1xf32>
    tpu.vector_store %arg10[%c0_18, %c289], %31 {strides = array<i32>} : memref<4x290xf32, #tpu.memory_space<vmem>>, vector<4x1xf32>,
    %c0_19 = arith.constant 0 : index
    %c0_20 = arith.constant 0 : index
    %34 = vector.load %arg3[%c0_19, %c0_20] : memref<16x36xf32, #tpu.memory_space<vmem>>, vector<16x36xf32>
    %c0_21 = arith.constant 0 : index
    %c0_22 = arith.constant 0 : index
    %35 = vector.load %arg10[%c0_21, %c0_22] : memref<4x290xf32, #tpu.memory_space<vmem>>, vector<4x256xf32>
    %c0_23 = arith.constant 0 : index
    %c2 = arith.constant 2 : index
    %36 = vector.load %arg10[%c0_23, %c2] : memref<4x290xf32, #tpu.memory_space<vmem>>, vector<4x256xf32>
    %37 = vector.shape_cast %18 : vector<1x256xi1> to vector<1x256xi1>
    %38 = vector.broadcast %37 : vector<1x256xi1> to vector<4x256xi1>
    %39 = arith.select %38, %36, %35 : vector<4x256xi1>, vector<4x256xf32>
    %c0_24 = arith.constant 0 : index
    %c1_25 = arith.constant 1 : index
    %40 = vector.load %arg10[%c0_24, %c1_25] : memref<4x290xf32, #tpu.memory_space<vmem>>, vector<4x256xf32>
    %c0_26 = arith.constant 0 : index
    %c2_27 = arith.constant 2 : index
    %41 = vector.load %arg10[%c0_26, %c2_27] : memref<4x290xf32, #tpu.memory_space<vmem>>, vector<4x256xf32>
    %c0_28 = arith.constant 0 : index
    %c0_29 = arith.constant 0 : index
    %42 = vector.load %arg10[%c0_28, %c0_29] : memref<4x290xf32, #tpu.memory_space<vmem>>, vector<4x256xf32>
    %43 = vector.shape_cast %20 : vector<1x256xi1> to vector<1x256xi1>
    %44 = vector.broadcast %43 : vector<1x256xi1> to vector<4x256xi1>
    %45 = arith.select %44, %42, %41 : vector<4x256xi1>, vector<4x256xf32>
    %c0_30 = arith.constant 0 : index
    %c16 = arith.constant 16 : index
    %46 = vector.load %arg10[%c0_30, %c16] : memref<4x290xf32, #tpu.memory_space<vmem>>, vector<4x256xf32>
    %c0_31 = arith.constant 0 : index
    %c18 = arith.constant 18 : index
    %47 = vector.load %arg10[%c0_31, %c18] : memref<4x290xf32, #tpu.memory_space<vmem>>, vector<4x256xf32>
    %48 = vector.shape_cast %18 : vector<1x256xi1> to vector<1x256xi1>
    %49 = vector.broadcast %48 : vector<1x256xi1> to vector<4x256xi1>
    %50 = arith.select %49, %47, %46 : vector<4x256xi1>, vector<4x256xf32>
    %c0_32 = arith.constant 0 : index
    %c17_33 = arith.constant 17 : index
    %51 = vector.load %arg10[%c0_32, %c17_33] : memref<4x290xf32, #tpu.memory_space<vmem>>, vector<4x256xf32>
    %c0_34 = arith.constant 0 : index
    %c18_35 = arith.constant 18 : index
    %52 = vector.load %arg10[%c0_34, %c18_35] : memref<4x290xf32, #tpu.memory_space<vmem>>, vector<4x256xf32>
    %c0_36 = arith.constant 0 : index
    %c16_37 = arith.constant 16 : index
    %53 = vector.load %arg10[%c0_36, %c16_37] : memref<4x290xf32, #tpu.memory_space<vmem>>, vector<4x256xf32>
    %54 = vector.shape_cast %20 : vector<1x256xi1> to vector<1x256xi1>
    %55 = vector.broadcast %54 : vector<1x256xi1> to vector<4x256xi1>
    %56 = arith.select %55, %53, %52 : vector<4x256xi1>, vector<4x256xf32>
    %c0_38 = arith.constant 0 : index
    %c32 = arith.constant 32 : index
    %57 = vector.load %arg10[%c0_38, %c32] : memref<4x290xf32, #tpu.memory_space<vmem>>, vector<4x256xf32>
    %c0_39 = arith.constant 0 : index
    %c34 = arith.constant 34 : index
    %58 = vector.load %arg10[%c0_39, %c34] : memref<4x290xf32, #tpu.memory_space<vmem>>, vector<4x256xf32>
    %59 = vector.shape_cast %18 : vector<1x256xi1> to vector<1x256xi1>
    %60 = vector.broadcast %59 : vector<1x256xi1> to vector<4x256xi1>
    %61 = arith.select %60, %58, %57 : vector<4x256xi1>, vector<4x256xf32>
    %c0_40 = arith.constant 0 : index
    %c33_41 = arith.constant 33 : index
    %62 = vector.load %arg10[%c0_40, %c33_41] : memref<4x290xf32, #tpu.memory_space<vmem>>, vector<4x256xf32>
    %c0_42 = arith.constant 0 : index
    %c34_43 = arith.constant 34 : index
    %63 = vector.load %arg10[%c0_42, %c34_43] : memref<4x290xf32, #tpu.memory_space<vmem>>, vector<4x256xf32>
    %c0_44 = arith.constant 0 : index
    %c32_45 = arith.constant 32 : index
    %64 = vector.load %arg10[%c0_44, %c32_45] : memref<4x290xf32, #tpu.memory_space<vmem>>, vector<4x256xf32>
    %65 = vector.shape_cast %20 : vector<1x256xi1> to vector<1x256xi1>
    %66 = vector.broadcast %65 : vector<1x256xi1> to vector<4x256xi1>
    %67 = arith.select %66, %64, %63 : vector<4x256xi1>, vector<4x256xf32>
    %68 = tpu.concatenate %39, %40, %45, %50, %51, %56, %61, %62, %67 in 0 : vector<4x256xf32>, vector<4x256xf32>, vector<4x256xf32>, vector<4x256xf32>, vector<4x256xf32>, vector<4x256xf32>, vector<4x256xf32>, vector<4x256xf32>, vector<4x256xf32> -> vector<36x256xf32>
    %cst_46 = arith.constant dense<0.000000e+00> : vector<16x256xf32>
    %69 = tpu.matmul %34, %68, %cst_46 {dimension_numbers = #tpu.dot_dimension_numbers<[1], [0], [0], [1], [0, 0, 1, 1], [], []>} : vector<16x36xf32>, vector<36x256xf32>, vector<16x256xf32> -> vector<16x256xf32>
    %c0_47 = arith.constant 0 : index
    %c0_48 = arith.constant 0 : index
    %70 = vector.load %arg4[%c0_47, %c0_48] : memref<16x1xf32, #tpu.memory_space<vmem>>, vector<16x1xf32>
    %71 = vector.broadcast %70 : vector<16x1xf32> to vector<16x256xf32>
    %72 = arith.addf %69, %71 : vector<16x256xf32>
    %c0_49 = arith.constant 0 : index
    %c17_50 = arith.constant 17 : index
    %73 = vector.load %arg11[%c0_49, %c17_50] : memref<16x290xf32, #tpu.memory_space<vmem>>, vector<16x256xf32>
    tpu.vector_store %arg11[%c0_49, %c17_50], %72 {strides = array<i32>} : memref<16x290xf32, #tpu.memory_space<vmem>>, vector<16x256xf32>,
    %c0_51 = arith.constant 0 : index
    %c33_52 = arith.constant 33 : index
    %74 = vector.load %arg11[%c0_51, %c33_52] : memref<16x290xf32, #tpu.memory_space<vmem>>, vector<16x16xf32>
    %c0_53 = arith.constant 0 : index
    %c1_54 = arith.constant 1 : index
    %75 = vector.load %arg11[%c0_53, %c1_54] : memref<16x290xf32, #tpu.memory_space<vmem>>, vector<16x16xf32>
    tpu.vector_store %arg11[%c0_53, %c1_54], %74 {strides = array<i32>} : memref<16x290xf32, #tpu.memory_space<vmem>>, vector<16x16xf32>,
    %c0_55 = arith.constant 0 : index
    %c241_56 = arith.constant 241 : index
    %76 = vector.load %arg11[%c0_55, %c241_56] : memref<16x290xf32, #tpu.memory_space<vmem>>, vector<16x16xf32>
    %c0_57 = arith.constant 0 : index
    %c273_58 = arith.constant 273 : index
    %77 = vector.load %arg11[%c0_57, %c273_58] : memref<16x290xf32, #tpu.memory_space<vmem>>, vector<16x16xf32>
    tpu.vector_store %arg11[%c0_57, %c273_58], %76 {strides = array<i32>} : memref<16x290xf32, #tpu.memory_space<vmem>>, vector<16x16xf32>,
    %cst_59 = arith.constant 0.000000e+00 : f32
    %78 = vector.broadcast %cst_59 : f32 to vector<16x1xf32>
    %c0_60 = arith.constant 0 : index
    %c0_61 = arith.constant 0 : index
    %79 = vector.load %arg11[%c0_60, %c0_61] : memref<16x290xf32, #tpu.memory_space<vmem>>, vector<16x1xf32>
    tpu.vector_store %arg11[%c0_60, %c0_61], %78 {strides = array<i32>} : memref<16x290xf32, #tpu.memory_space<vmem>>, vector<16x1xf32>,
    %c0_62 = arith.constant 0 : index
    %c289_63 = arith.constant 289 : index
    %80 = vector.load %arg11[%c0_62, %c289_63] : memref<16x290xf32, #tpu.memory_space<vmem>>, vector<16x1xf32>
    tpu.vector_store %arg11[%c0_62, %c289_63], %78 {strides = array<i32>} : memref<16x290xf32, #tpu.memory_space<vmem>>, vector<16x1xf32>,
    %c0_64 = arith.constant 0 : index
    %c0_65 = arith.constant 0 : index
    %81 = vector.load %arg5[%c0_64, %c0_65] : memref<16x144xf32, #tpu.memory_space<vmem>>, vector<16x144xf32>
    %c0_66 = arith.constant 0 : index
    %c0_67 = arith.constant 0 : index
    %82 = vector.load %arg11[%c0_66, %c0_67] : memref<16x290xf32, #tpu.memory_space<vmem>>, vector<16x256xf32>
    %c0_68 = arith.constant 0 : index
    %c2_69 = arith.constant 2 : index
    %83 = vector.load %arg11[%c0_68, %c2_69] : memref<16x290xf32, #tpu.memory_space<vmem>>, vector<16x256xf32>
    %84 = vector.shape_cast %18 : vector<1x256xi1> to vector<1x256xi1>
    %85 = vector.broadcast %84 : vector<1x256xi1> to vector<16x256xi1>
    %86 = arith.select %85, %83, %82 : vector<16x256xi1>, vector<16x256xf32>
    %c0_70 = arith.constant 0 : index
    %c1_71 = arith.constant 1 : index
    %87 = vector.load %arg11[%c0_70, %c1_71] : memref<16x290xf32, #tpu.memory_space<vmem>>, vector<16x256xf32>
    %c0_72 = arith.constant 0 : index
    %c2_73 = arith.constant 2 : index
    %88 = vector.load %arg11[%c0_72, %c2_73] : memref<16x290xf32, #tpu.memory_space<vmem>>, vector<16x256xf32>
    %c0_74 = arith.constant 0 : index
    %c0_75 = arith.constant 0 : index
    %89 = vector.load %arg11[%c0_74, %c0_75] : memref<16x290xf32, #tpu.memory_space<vmem>>, vector<16x256xf32>
    %90 = vector.shape_cast %20 : vector<1x256xi1> to vector<1x256xi1>
    %91 = vector.broadcast %90 : vector<1x256xi1> to vector<16x256xi1>
    %92 = arith.select %91, %89, %88 : vector<16x256xi1>, vector<16x256xf32>
    %c0_76 = arith.constant 0 : index
    %c16_77 = arith.constant 16 : index
    %93 = vector.load %arg11[%c0_76, %c16_77] : memref<16x290xf32, #tpu.memory_space<vmem>>, vector<16x256xf32>
    %c0_78 = arith.constant 0 : index
    %c18_79 = arith.constant 18 : index
    %94 = vector.load %arg11[%c0_78, %c18_79] : memref<16x290xf32, #tpu.memory_space<vmem>>, vector<16x256xf32>
    %95 = vector.shape_cast %18 : vector<1x256xi1> to vector<1x256xi1>
    %96 = vector.broadcast %95 : vector<1x256xi1> to vector<16x256xi1>
    %97 = arith.select %96, %94, %93 : vector<16x256xi1>, vector<16x256xf32>
    %c0_80 = arith.constant 0 : index
    %c17_81 = arith.constant 17 : index
    %98 = vector.load %arg11[%c0_80, %c17_81] : memref<16x290xf32, #tpu.memory_space<vmem>>, vector<16x256xf32>
    %c0_82 = arith.constant 0 : index
    %c18_83 = arith.constant 18 : index
    %99 = vector.load %arg11[%c0_82, %c18_83] : memref<16x290xf32, #tpu.memory_space<vmem>>, vector<16x256xf32>
    %c0_84 = arith.constant 0 : index
    %c16_85 = arith.constant 16 : index
    %100 = vector.load %arg11[%c0_84, %c16_85] : memref<16x290xf32, #tpu.memory_space<vmem>>, vector<16x256xf32>
    %101 = vector.shape_cast %20 : vector<1x256xi1> to vector<1x256xi1>
    %102 = vector.broadcast %101 : vector<1x256xi1> to vector<16x256xi1>
    %103 = arith.select %102, %100, %99 : vector<16x256xi1>, vector<16x256xf32>
    %c0_86 = arith.constant 0 : index
    %c32_87 = arith.constant 32 : index
    %104 = vector.load %arg11[%c0_86, %c32_87] : memref<16x290xf32, #tpu.memory_space<vmem>>, vector<16x256xf32>
    %c0_88 = arith.constant 0 : index
    %c34_89 = arith.constant 34 : index
    %105 = vector.load %arg11[%c0_88, %c34_89] : memref<16x290xf32, #tpu.memory_space<vmem>>, vector<16x256xf32>
    %106 = vector.shape_cast %18 : vector<1x256xi1> to vector<1x256xi1>
    %107 = vector.broadcast %106 : vector<1x256xi1> to vector<16x256xi1>
    %108 = arith.select %107, %105, %104 : vector<16x256xi1>, vector<16x256xf32>
    %c0_90 = arith.constant 0 : index
    %c33_91 = arith.constant 33 : index
    %109 = vector.load %arg11[%c0_90, %c33_91] : memref<16x290xf32, #tpu.memory_space<vmem>>, vector<16x256xf32>
    %c0_92 = arith.constant 0 : index
    %c34_93 = arith.constant 34 : index
    %110 = vector.load %arg11[%c0_92, %c34_93] : memref<16x290xf32, #tpu.memory_space<vmem>>, vector<16x256xf32>
    %c0_94 = arith.constant 0 : index
    %c32_95 = arith.constant 32 : index
    %111 = vector.load %arg11[%c0_94, %c32_95] : memref<16x290xf32, #tpu.memory_space<vmem>>, vector<16x256xf32>
    %112 = vector.shape_cast %20 : vector<1x256xi1> to vector<1x256xi1>
    %113 = vector.broadcast %112 : vector<1x256xi1> to vector<16x256xi1>
    %114 = arith.select %113, %111, %110 : vector<16x256xi1>, vector<16x256xf32>
    %115 = tpu.concatenate %86, %87, %92, %97, %98, %103, %108, %109, %114 in 0 : vector<16x256xf32>, vector<16x256xf32>, vector<16x256xf32>, vector<16x256xf32>, vector<16x256xf32>, vector<16x256xf32>, vector<16x256xf32>, vector<16x256xf32>, vector<16x256xf32> -> vector<144x256xf32>
    %cst_96 = arith.constant dense<0.000000e+00> : vector<16x256xf32>
    %116 = tpu.matmul %81, %115, %cst_96 {dimension_numbers = #tpu.dot_dimension_numbers<[1], [0], [0], [1], [0, 0, 1, 1], [], []>} : vector<16x144xf32>, vector<144x256xf32>, vector<16x256xf32> -> vector<16x256xf32>
    %c0_97 = arith.constant 0 : index
    %c0_98 = arith.constant 0 : index
    %117 = vector.load %arg6[%c0_97, %c0_98] : memref<16x1xf32, #tpu.memory_space<vmem>>, vector<16x1xf32>
    %118 = vector.broadcast %117 : vector<16x1xf32> to vector<16x256xf32>
    %119 = arith.addf %116, %118 : vector<16x256xf32>
    %cst_99 = arith.constant 0.000000e+00 : f32
    %120 = vector.broadcast %cst_99 : f32 to vector<16x256xf32>
    %121 = arith.maximumf %119, %120 : vector<16x256xf32>
    %c0_100 = arith.constant 0 : index
    %c0_101 = arith.constant 0 : index
    %122 = vector.load %arg7[%c0_100, %c0_101] : memref<16x1xf32, #tpu.memory_space<vmem>>, vector<16x1xf32>
    %123 = vector.broadcast %122 : vector<16x1xf32> to vector<16x256xf32>
    %124 = arith.mulf %121, %123 : vector<16x256xf32>
    %cst_102 = arith.constant dense<0.000000e+00> : vector<256xf32>
    %125 = vector.multi_reduction <add>, %124, %cst_102 [0] : vector<16x256xf32> to vector<256xf32>
    %126 = vector.shape_cast %125 : vector<256xf32> to vector<1x256xf32>
    %c0_103 = arith.constant 0 : index
    %c0_104 = arith.constant 0 : index
    %127 = vector.load %arg8[%c0_103, %c0_104] : memref<1x1xf32, #tpu.memory_space<vmem>>, vector<1x1xf32>
    %128 = vector.broadcast %127 : vector<1x1xf32> to vector<1x256xf32>
    %129 = arith.addf %126, %128 : vector<1x256xf32>
    %130 = arith.negf %129 : vector<1x256xf32>
    %131 = math.exp %130 : vector<1x256xf32>
    %cst_105 = arith.constant 1.000000e+00 : f32
    %132 = vector.broadcast %cst_105 : f32 to vector<1x256xf32>
    %133 = arith.addf %132, %131 : vector<1x256xf32>
    %134 = arith.divf %132, %133 : vector<1x256xf32>
    %c0_106 = arith.constant 0 : index
    %c0_107 = arith.constant 0 : index
    %c0_108 = arith.constant 0 : index
    %135 = vector.load %arg9[%c0_106, %c0_107, %c0_108] : memref<1x1x256xf32, #tpu.memory_space<vmem>>, vector<1x1x256xf32>
    %136 = vector.shape_cast %135 : vector<1x1x256xf32> to vector<1x256xf32>
    %137 = vector.shape_cast %134 : vector<1x256xf32> to vector<1x1x256xf32>
    tpu.vector_store %arg9[%c0_106, %c0_107, %c0_108], %137 {strides = array<i32>} : memref<1x1x256xf32, #tpu.memory_space<vmem>>, vector<1x1x256xf32>,
    return
  }
  func.func @transform_0(%arg0: i32) -> (i32, i32, i32) {
    %c0_i32 = arith.constant 0 : i32
    %c0_i32_0 = arith.constant 0 : i32
    %c0_i32_1 = arith.constant 0 : i32
    return %arg0, %c0_i32, %c0_i32_0 : i32, i32, i32
  }
  func.func @transform_1(%arg0: i32) -> (i32, i32, i32) {
    %c0_i32 = arith.constant 0 : i32
    %c0_i32_0 = arith.constant 0 : i32
    %c0_i32_1 = arith.constant 0 : i32
    return %arg0, %c0_i32, %c0_i32_0 : i32, i32, i32
  }
  func.func @transform_2(%arg0: i32) -> (i32, i32) {
    %c0_i32 = arith.constant 0 : i32
    %c0_i32_0 = arith.constant 0 : i32
    %c0_i32_1 = arith.constant 0 : i32
    return %c0_i32, %c0_i32_0 : i32, i32
  }
  func.func @transform_3(%arg0: i32) -> (i32, i32) {
    %c0_i32 = arith.constant 0 : i32
    %c0_i32_0 = arith.constant 0 : i32
    %c0_i32_1 = arith.constant 0 : i32
    return %c0_i32, %c0_i32_0 : i32, i32
  }
  func.func @transform_4(%arg0: i32) -> (i32, i32) {
    %c0_i32 = arith.constant 0 : i32
    %c0_i32_0 = arith.constant 0 : i32
    %c0_i32_1 = arith.constant 0 : i32
    return %c0_i32, %c0_i32_0 : i32, i32
  }
  func.func @transform_5(%arg0: i32) -> (i32, i32) {
    %c0_i32 = arith.constant 0 : i32
    %c0_i32_0 = arith.constant 0 : i32
    %c0_i32_1 = arith.constant 0 : i32
    return %c0_i32, %c0_i32_0 : i32, i32
  }
  func.func @transform_6(%arg0: i32) -> (i32, i32) {
    %c0_i32 = arith.constant 0 : i32
    %c0_i32_0 = arith.constant 0 : i32
    %c0_i32_1 = arith.constant 0 : i32
    return %c0_i32, %c0_i32_0 : i32, i32
  }
  func.func @transform_7(%arg0: i32) -> (i32, i32) {
    %c0_i32 = arith.constant 0 : i32
    %c0_i32_0 = arith.constant 0 : i32
    %c0_i32_1 = arith.constant 0 : i32
    return %c0_i32, %c0_i32_0 : i32, i32
  }
  func.func @transform_8(%arg0: i32) -> (i32, i32, i32) {
    %c0_i32 = arith.constant 0 : i32
    %c0_i32_0 = arith.constant 0 : i32
    %c0_i32_1 = arith.constant 0 : i32
    return %arg0, %c0_i32, %c0_i32_0 : i32, i32, i32
  }
}

</mosaic_0001>

<bundles_post_ra>
// kernel: overexposure_forward.1
= control target key start
LH: loop header
LB: loop body
LE: loop exit
PB: predicated region body
PF: predicated region fallthrough
CT: control target
= control target key end

     0   :  { %s1618_s29 = smov 0   ;;  %s2020_s0 = inlined_call_operand.vmem [shape: f32[2,1,256], index: 0, kind: input, shape index: {}]   ;;  %s2021_s1 = inlined_call_operand.vmem [shape: f32[2,3,256], index: 1, kind: input, shape index: {}]   ;;  %s2022_s2 = inlined_call_operand.vmem [shape: f32[16,36], index: 2, kind: input, shape index: {}]   ;;  %s2023_s3 = inlined_call_operand.vmem [shape: f32[16,1], index: 3, kind: input, shape index: {}]   ;;  %s2024_s4 = inlined_call_operand.vmem [shape: f32[16,144], index: 4, kind: input, shape index: {}]   ;;  %s2025_s5 = inlined_call_operand.vmem [shape: f32[16,1], index: 5, kind: input, shape index: {}]   ;;  %s2026_s6 = inlined_call_operand.vmem [shape: f32[16,1], index: 6, kind: input, shape index: {}]   ;;  %s2027_s7 = inlined_call_operand.<no memory space> [shape: f32[1,1], index: 7, kind: input, shape index: {}]   ;;  %s2028_s8 = inlined_call_operand.vmem [shape: f32[2,1,256], index: 8, kind: output, shape index: {}]  }
   0x1   :  { %v13_v0 = vstv %s2027_s7 }
   0x2   :  { %14 = vst [vmem:[#allocation4] sm:$0x1] %v13_v0 }
   0x3 LB: > { %s1305_s30 = sadd.s32 4294967295, %s1556_s29   ;;  %p1309_p0 = scmp.ge.s32.totalorder %s1556_s29, 1  ;;  %s1556_s29 = sphi %s1618_s29, %s20_s29  }
   0x4   : > { %p273_p1 = scmp.lt.s32.totalorder %s1556_s29, 3 }
   0x6   : > { %p274_p2 = pnand %p1309_p0, %p273_p1 }
   0x7   : > { %p310_p3 = scmp.lt.s32.totalorder (!%p274_p2), %s1305_s30, 1  ;;  %s1558_s16 = smov (!%p274_p2), 17  }
   0x8   : > { %277 = sbr.rel (%p274_p2) target bundleno = 1288 (0x508), region = 52  ;;  %s1559_s17 = smov (!%p274_p2), 96  }
   0x9   : > { %s1560_s18 = smov (!%p274_p2), 32   ;;  %s1562_s19 = smov (!%p274_p2), 126  }
   0xa   : > { %s1563_s20 = smov (!%p274_p2), 110   ;;  %s1564_s21 = smov (!%p274_p2), 112  }
   0xb   : > { %s1565_s22 = smov (!%p274_p2), 94   ;;  %s1566_s23 = smov (!%p274_p2), 111  }
   0xc   : > { %s1567_s24 = smov (!%p274_p2), 95   ;;  %s1568_s25 = smov (!%p274_p2), 127  }
   0xd   : > { %s2045_s30 = smov (!%p310_p3, %s1305_s30), 1  ;;  %v323_v4 = vlaneseq  ;;  %vm359_vm2 = vcmask 138240   ;;  %vm376_vm4 = vcmask 1043593   ;;  %vm377_vm5 = vcmask 1047557  }
   0xe   : > { %s1310_s7 = sshll.u32 %s2045_s30, 1  ;;  %s1328_s9 = sshll.u32 %s2045_s30, 3  ;;  %vm380_vm6 = vcmask 134145   ;;  %vm378_vm7 = vmor %vm377_vm5, %vm376_vm4  ;;  %vm387_vm8 = vcmask 134152   ;;  %vm399_vm9 = vcmask 3072   ;;  %v1561_v14 = vmov 0.0  }
   0xf   : > { %s313_s12 = scalar_lea.vmem %s2020_s0, %s1310_s7  ;;  %s318_s15 = scalar_lea.vmem %s2021_s1, %s1328_s9  ;;  %vm363_vm0 = vcmp.ge.s32.totalorder %v323_v4, 17  ;;  %vm364_vm1 = vcmp.lt.s32.totalorder %v323_v4, 273  ;;  %vm394_vm10 = vcmask 261120   ;;  %vm397_vm11 = vcmask 265352  }
  0x10   : > { %v354_v1 = vld [vmem:[%s313_s12] sm:$0x3]  ;;  %vm365_vm3 = vmand %vm363_vm0, %vm364_vm1  ;;  %vm401_vm12 = vcmask 273672   ;;  %vm482_vm13 = vcmask 900096   ;;  %vm499_vm14 = vcmask 916480   ;;  %vm425_vm0 = vcmask 1031168   ;;  %s322_s12 = scalar_lea.vmem %s2028_s8, %s1310_s7 }
  0x11   : > { %356 = vrot.lane.b32.xlu0 %v354_v1, %s1558_s16  ;;  %v367_v2 = vld [vmem:[%s318_s15] sm:$0x77] }
  0x12   : > { %v369_v3 = vrot.slane %v367_v2, 7 }
  0x19   : > { %370 = vrot.lane.b32.xlu0 %v369_v3, %s1558_s16 }
  0x83   : > { %v357_v5 = vpop.permute.xlu0 %356 }
  0x84   : > { %v358_v6 = vrot.slane %v357_v5, 7 }
  0x86   : > { %v360_v7 = vsel %vm359_vm2, %v358_v6, %v357_v5 }
  0x87   : > { %366 = vst.msk [vmem:[#allocation2] ss:$4 sm:$0x7] %vm365_vm3, %v360_v7  ;;  %vm689_vm3 = vcmask 1043456  }
  0x8b   : > { %v371_v8 = vpop.permute.xlu0 %370 }
  0x8c   : > { %v372_v9 = vrot.slane %v371_v8, 4 }
  0x8e   : > { %v373_v10 = vsel %vm359_vm2, %v372_v9, %v371_v8  ;;  %381 = vst.msk [vmem:[#allocation2 + $0x8] sm:$0xe] %vm380_vm6, %v372_v9  ;;  %vm558_vm6 = vcmask 769024  }
  0x8f   : > { %379 = vst.msk [vmem:[#allocation2] sm:$0xee] %vm378_vm7, %v373_v10  ;;  %vm575_vm7 = vcmask 785408  }
  0x96   : > { %v382_v11 = vld [vmem:[#allocation2] sm:$0xf]  ;;  %v389_v12 = vld [vmem:[#allocation2 + $0x4] sm:$0xff] }
  0x97   : > { %384 = vrot.lane.b32.xlu1 %v382_v11, %s1559_s17 }
  0x9f   : > { %391 = vrot.lane.b32.xlu1 %v389_v12, %s1560_s18 }
 0x109   : > { %v385_v13 = vpop.permute.xlu1 %384 }
 0x10a   : > { %388 = vst.msk [vmem:[#allocation2] sm:$0xf] %vm387_vm8, %v385_v13  ;;  %vm684_vm8 = vcmask 777216  }
 0x10b   : > { %400 = vst.msk [vmem:[#allocation2] sm:$0xf] %vm399_vm9, %v1561_v14  ;;  %vm658_vm9 = vcmask 908288  }
 0x111   : > { %v392_v15 = vpop.permute.xlu1 %391 }
 0x112   : > { %v1647_v16 = vld [vmem:[#allocation2] sm:$0xff]  ;;  %v393_v17 = vrot.slane %v392_v15, 4 }
 0x113   : > { %413 = vst [vmem:[#allocation1] ss:$2 sm:$0xff] %v1647_v16 }
 0x114   : > { %v395_v18 = vsel %vm394_vm10, %v392_v15, %v393_v17 }
 0x115   : > { %398 = vst.msk [vmem:[#allocation2 + $0x8] sm:$0xf] %vm397_vm11, %v395_v18  ;;  %vm2029_vm11 = vcmask 1039360  }
 0x116   : > { %402 = vst.msk [vmem:[#allocation2 + $0x8] sm:$0xf] %vm401_vm12, %v1561_v14  ;;  %vm710_vm12 = vcmask 293888  }
 0x11a   : > { %v416_v19 = vld.sshfl [vmem:[#allocation1] sm:$0xff pattern:$0x75316420]  ;;  %v1652_v20 = vld.sshfl [vmem:[#allocation1 + $0x8] sm:$0xff pattern:$0x75316420] }
 0x11b   : > { %430 = vst [vmem:[#allocation1] ss:$2 sm:$0xff] %v1647_v16 }
 0x11d   : > { %v406_v21 = vld [vmem:[#allocation2 + $0x8] sm:$0xf] }
 0x11e   : > { %415 = vst [vmem:[#allocation1 + $0x10] ss:$2 sm:$0xff] %v406_v21  ;;  %v467_v27 = vld [vmem:[#allocation2 + $0x8] sm:$0xf] }
 0x11f   : > { %v543_v45 = vld [vmem:[#allocation2 + $0x8] sm:$0xf] }
 0x120   : > { %v438_v63 = vld [vmem:[#allocation2 + $0x8] sm:$0xf] }
 0x121   : > { %v507_v3 = vld [vmem:[#allocation2 + $0x8] sm:$0xf] }
 0x122   : > { %v1655_v22 = vld.sshfl [vmem:[#allocation1] sm:$0xff pattern:$0x75316420]  ;;  %v1657_v23 = vld.sshfl [vmem:[#allocation1 + $0x8] sm:$0xff pattern:$0x75316420] }
 0x123   : > { %443 = vst [vmem:[#allocation1] ss:$2 sm:$0xff] %v1647_v16  ;;  %v583_v8 = vld [vmem:[#allocation2 + $0x8] sm:$0xf] }
 0x125   : > { %v1660_v24 = vld.sshfl [vmem:[#allocation1 + $0x10] sm:$0xff pattern:$0x75316420] }
 0x126   : > { %450 = vst [vmem:[#allocation1 + $0x10] ss:$2 sm:$0xff] %v406_v21  ;;  %v1399_v18 = vpack.i.bf16 %v1660_v24, %v1652_v20 }
 0x12a   : > { %v1662_v25 = vld.sshfl [vmem:[#allocation1] sm:$0xff pattern:$0x75316420]  ;;  %v1664_v26 = vld.sshfl [vmem:[#allocation1 + $0x8] sm:$0xff pattern:$0x75316420] }
 0x12b   : > { %448 = vst [vmem:[#allocation1] ss:$2 sm:$0xff] %v1647_v16 }
 0x12d   : > { %v453_v28 = vld.sshfl [vmem:[#allocation1 + $0x10] sm:$0xff pattern:$0x75316420] }
 0x12e   : > { %v1349_v29 = vpack.i.bf16 %v416_v19, %v453_v28  ;;  %472 = vst [vmem:[#allocation1 + $0x10] ss:$2 sm:$0xff] %v467_v27 }
 0x130   : > { %1350 = vrot.lane.b32.xlu1 %v1349_v29, %s1562_s19 }
 0x132   : > { %v451_v30 = vld.sshfl [vmem:[#allocation1] sm:$0xff pattern:$0x75316420]  ;;  %v452_v31 = vld.sshfl [vmem:[#allocation1 + $0x8] sm:$0xff pattern:$0x75316420] }
 0x133   : > { %v1354_v32 = vpack.i.bf16 %v452_v31, %v451_v30  ;;  %470 = vst [vmem:[#allocation1] ss:$2 sm:$0xff] %v1647_v16 }
 0x135   : > { %1355 = vrot.lane.b32.xlu0 %v1354_v32, %s1562_s19  ;;  %v475_v33 = vld.sshfl [vmem:[#allocation1 + $0x10] sm:$0xff pattern:$0x75316420] }
 0x136   : > { %489 = vst [vmem:[#allocation1 + $0x10] ss:$2 sm:$0xff] %v467_v27 }
 0x13a   : > { %v473_v34 = vld.sshfl [vmem:[#allocation1] sm:$0xff pattern:$0x75316420]  ;;  %v474_v35 = vld.sshfl [vmem:[#allocation1 + $0x8] sm:$0xff pattern:$0x75316420] }
 0x13b   : > { %v1359_v36 = vpack.i.bf16 %v475_v33, %v474_v35  ;;  %487 = vst [vmem:[#allocation1] ss:$2 sm:$0xff] %v1647_v16 }
 0x13d   : > { %1360 = vrot.lane.b32.xlu2 %v1359_v36, %s1563_s20  ;;  %v492_v37 = vld.sshfl [vmem:[#allocation1 + $0x10] sm:$0xff pattern:$0x75316420] }
 0x13e   : > { %510 = vst [vmem:[#allocation1 + $0x10] ss:$2 sm:$0xff] %v467_v27 }
 0x142   : > { %v491_v38 = vld.sshfl [vmem:[#allocation1 + $0x8] sm:$0xff pattern:$0x75316420]  ;;  %v490_v39 = vld.sshfl [vmem:[#allocation1] sm:$0xff pattern:$0x75316420] }
 0x143   : > { %v1369_v40 = vpack.i.bf16 %v492_v37, %v491_v38  ;;  %508 = vst [vmem:[#allocation1] ss:$2 sm:$0xff] %v1647_v16 }
 0x145   : > { %1370 = vrot.lane.b32.xlu0 %v1369_v40, %s1564_s21  ;;  %v513_v41 = vld.sshfl [vmem:[#allocation1 + $0x10] sm:$0xff pattern:$0x75316420] }
 0x146   : > { %v1364_v42 = vpack.i.bf16 %v490_v39, %v513_v41  ;;  %526 = vst [vmem:[#allocation1 + $0x10] ss:$2 sm:$0xff] %v467_v27  ;;  %v324_v27 = vand.u32 127, %v323_v4 }
 0x148   : > { %1365 = vrot.lane.b32.xlu2 %v1364_v42, %s1564_s21  ;;  %v325_v20 = vadd.s32 128, %v324_v27 }
 0x14a   : > { %v511_v43 = vld.sshfl [vmem:[#allocation1] sm:$0xff pattern:$0x75316420]  ;;  %v512_v44 = vld.sshfl [vmem:[#allocation1 + $0x8] sm:$0xff pattern:$0x75316420] }
 0x14b   : > { %524 = vst [vmem:[#allocation1] ss:$2 sm:$0xff] %v1647_v16  ;;  %v1379_v51 = vpack.i.bf16 %v512_v44, %v511_v43  ;;  %v337_v30 = vand.u32 15, %v325_v20 }
 0x14d   : > { %v529_v46 = vld.sshfl [vmem:[#allocation1 + $0x10] sm:$0xff pattern:$0x75316420]  ;;  %vm1710_vm15 = vcmp.eq.s32.totalorder %v337_v30, 0  ;;  %vm1718_vm1 = vcmp.eq.s32.totalorder %v337_v30, 15 }
 0x14e   : > { %v1374_v47 = vpack.i.bf16 %v473_v34, %v529_v46  ;;  %548 = vst [vmem:[#allocation1 + $0x10] ss:$2 sm:$0xff] %v543_v45 }
 0x150   : > { %1375 = vrot.lane.b32.xlu1 %v1374_v47, %s1563_s20 }
 0x152   : > { %v527_v48 = vld.sshfl [vmem:[#allocation1] sm:$0xff pattern:$0x75316420]  ;;  %v528_v49 = vld.sshfl [vmem:[#allocation1 + $0x8] sm:$0xff pattern:$0x75316420] }
 0x153   : > { %546 = vst [vmem:[#allocation1] ss:$2 sm:$0xff] %v1647_v16  ;;  %v1384_v54 = vpack.i.bf16 %v528_v49, %v527_v48 }
 0x155   : > { %v551_v50 = vld.sshfl [vmem:[#allocation1 + $0x10] sm:$0xff pattern:$0x75316420] }
 0x156   : > { %556 = vrot.lane.b32.xlu0 %v551_v50, %s1565_s22  ;;  %565 = vst [vmem:[#allocation1 + $0x10] ss:$2 sm:$0xff] %v543_v45 }
 0x158   : > { %1380 = vrot.lane.b32.xlu1 %v1379_v51, %s1564_s21  ;;  %v330_v51 = vand.u32 15, %v324_v27 }
 0x15a   : > { %v549_v52 = vld.sshfl [vmem:[#allocation1] sm:$0xff pattern:$0x75316420]  ;;  %v550_v53 = vld.sshfl [vmem:[#allocation1 + $0x8] sm:$0xff pattern:$0x75316420] }
 0x15b   : > { %563 = vst [vmem:[#allocation1] ss:$2 sm:$0xff] %v1647_v16  ;;  %v1389_v59 = vpack.i.bf16 %v550_v53, %v549_v52  ;;  %vm1736_vm4 = vcmp.eq.s32.totalorder %v330_v51, 0  ;;  %vm1741_vm5 = vcmp.eq.s32.totalorder %v330_v51, 15 }
 0x15d   : > { %v568_v55 = vld.sshfl [vmem:[#allocation1 + $0x10] sm:$0xff pattern:$0x75316420] }
 0x15e   : > { %1385 = vrot.lane.b32.xlu0 %v1384_v54, %s1563_s20  ;;  %573 = vrot.lane.b32.xlu2 %v568_v55, %s1559_s17  ;;  %586 = vst [vmem:[#allocation1 + $0x10] ss:$2 sm:$0xff] %v543_v45 }
 0x162   : > { %v566_v56 = vld.sshfl [vmem:[#allocation1] sm:$0xff pattern:$0x75316420]  ;;  %v567_v57 = vld.sshfl [vmem:[#allocation1 + $0x8] sm:$0xff pattern:$0x75316420] }
 0x163   : > { %v1394_v58 = vpack.i.bf16 %v567_v57, %v566_v56  ;;  %584 = vst [vmem:[#allocation1] ss:$2 sm:$0xff] %v1647_v16 }
 0x165   : > { %1395 = vrot.lane.b32.xlu1 %v1394_v58, %s1559_s17  ;;  %v589_v60 = vld.sshfl [vmem:[#allocation1 + $0x10] sm:$0xff pattern:$0x75316420] }
 0x166   : > { %1390 = vrot.lane.b32.xlu2 %v1389_v59, %s1565_s22  ;;  %594 = vrot.lane.b32.xlu0 %v589_v60, %s1559_s17  ;;  %602 = vst [vmem:[#allocation1 + $0x10] ss:$2 sm:$0xff] %v543_v45 }
 0x16a   : > { %v588_v61 = vld.sshfl [vmem:[#allocation1 + $0x8] sm:$0xff pattern:$0x75316420]  ;;  %v587_v62 = vld.sshfl [vmem:[#allocation1] sm:$0xff pattern:$0x75316420] }
 0x16b   : > { %600 = vst [vmem:[#allocation1] ss:$2 sm:$0xff] %v1647_v16 }
 0x16d   : > { %v605_v0 = vld.sshfl [vmem:[#allocation1 + $0x10] sm:$0xff pattern:$0x75316420] }
 0x16e   : > { %590 = vrot.lane.b32.xlu2 %v587_v62, %s1559_s17  ;;  %610 = vrot.lane.b32.xlu0 %v605_v0, %s1565_s22  ;;  %623 = vst [vmem:[#allocation1 + $0x11] ss:$2 sm:$0xff] %v438_v63 }
 0x172   : > { %v603_v1 = vld.sshfl [vmem:[#allocation1] sm:$0xff pattern:$0x75316420]  ;;  %v604_v2 = vld.sshfl [vmem:[#allocation1 + $0x8] sm:$0xff pattern:$0x75316420] }
 0x173   : > { %606 = vrot.lane.b32.xlu1 %v603_v1, %s1565_s22  ;;  %621 = vst [vmem:[#allocation1 + $0x1] ss:$2 sm:$0xff] %v1647_v16 }
 0x175   : > { %v626_v5 = vld.sshfl [vmem:[#allocation1 + $0x10] sm:$0xff pattern:$0x75316420] }
 0x176   : > { %592 = vrot.lane.b32.xlu2 %v588_v61, %s1559_s17  ;;  %648 = vst [vmem:[#allocation1 + $0x10] ss:$2 sm:$0xff] %v507_v3 }
 0x17a   : > { %v624_v6 = vld.sshfl [vmem:[#allocation1] sm:$0xff pattern:$0x75316420]  ;;  %v625_v7 = vld.sshfl [vmem:[#allocation1 + $0x8] sm:$0xff pattern:$0x75316420] }
 0x17b   : > { %646 = vst [vmem:[#allocation1] ss:$2 sm:$0xff] %v1647_v16 }
 0x17d   : > { %v651_v9 = vld.sshfl [vmem:[#allocation1 + $0x10] sm:$0xff pattern:$0x75316420] }
 0x17e   : > { %608 = vrot.lane.b32.xlu2 %v604_v2, %s1565_s22  ;;  %674 = vst [vmem:[#allocation1 + $0x11] ss:$2 sm:$0xff] %v583_v8 }
 0x182   : > { %v649_v10 = vld.sshfl [vmem:[#allocation1] sm:$0xff pattern:$0x75316420]  ;;  %v650_v11 = vld.sshfl [vmem:[#allocation1 + $0x8] sm:$0xff pattern:$0x75316420] }
 0x183   : > { %672 = vst [vmem:[#allocation1 + $0x1] ss:$2 sm:$0xff] %v1647_v16  ;;  %v1404_v19 = vpack.i.bf16 %v650_v11, %v649_v10  ;;  %v1414_v16 = vpack.i.bf16 %v625_v7, %v624_v6 }
 0x185   : > { %v677_v12 = vld.sshfl [vmem:[#allocation1 + $0x10] sm:$0xff pattern:$0x75316420] }
 0x186   : > { %656 = vrot.lane.b32.xlu2 %v651_v9, %s1566_s23  ;;  %682 = vrot.lane.b32.xlu1 %v677_v12, %s1567_s24 }
 0x18a   : > { %v675_v13 = vld.sshfl [vmem:[#allocation1] sm:$0xff pattern:$0x75316420]  ;;  %v676_v15 = vld.sshfl [vmem:[#allocation1 + $0x8] sm:$0xff pattern:$0x75316420] }
 0x18b   : > { %v1409_v17 = vpack.i.bf16 %v676_v15, %v675_v13 }
 0x18d   : > { %1410 = vrot.lane.b32.xlu0 %v1409_v17, %s1567_s24 }
 0x18e   : > { %1400 = vrot.lane.b32.xlu2 %v1399_v18, %s1562_s19  ;;  %1405 = vrot.lane.b32.xlu1 %v1404_v19, %s1566_s23  ;;  %v698_v19 = vld [vmem:[%s2023_s3] sm:$0xff] }
 0x195   : > { %1415 = vrot.lane.b32.xlu0 %v1414_v16, %s1568_s25  ;;  %v699_v16 = vld [vmem:[%s2023_s3 + $0x8] sm:$0xff] }
 0x196   : > { %631 = vrot.lane.b32.xlu1 %v626_v5, %s1568_s25 }
 0x197   : > { %v1361_v21 = vpop.permute.xlu2 %1360 }
 0x198   : > { %v1363_v31 = vunpack.i.h.bf16 %v1361_v21  ;;  %v1362_v32 = vunpack.i.l.bf16 %v1361_v21  ;;  %v1569_v21 = vmov 0  }
 0x199   : > { %1420 = vset.pattern.permute.xlu0 %v1569_v21  ;;  %1419 = vset.pattern.permute.xlu2 %v1569_v21 }
 0x19a   : > { %v484_v42 = vsel %vm482_vm13, %v1362_v32, %v1363_v31  ;;  %707 = vperm.xlu2 %1419, %v699_v16   ;;  %1541 = vset.pattern.permute.xlu1 %v1569_v21 }
 0x19d   : > { %702 = vperm.xlu0 %1420, %v698_v19   ;;  %v403_v19 = vld [vmem:[%s2022_s2] sm:$0xff] }
 0x1a2   : > { %v1706_v29 = vpop.permute.xlu2 %1365  ;;  %v1708_v24 = vpop.permute.xlu1 %1350 }
 0x1a3   : > { %v1352_v36 = vunpack.i.l.bf16 %v1708_v24  ;;  %v1368_v37 = vunpack.i.h.bf16 %v1706_v29 }
 0x1a7   : > { %v1356_v28 = vpop.permute.xlu0 %1355 }
 0x1a8   : > { %v1358_v33 = vunpack.i.h.bf16 %v1356_v28  ;;  %v1357_v50 = vunpack.i.l.bf16 %v1356_v28 }
 0x1aa   : > { %v461_v45 = vsel %vm425_vm0, %v1358_v33, %v1352_v36 }
 0x1ab   : > { %v465_v48 = vsel %vm1718_vm1, %v1664_v26, %v461_v45  ;;  %v460_v26 = vsel %vm425_vm0, %v1357_v50, %v1358_v33 }
 0x1ac   : > { %v464_v61 = vsel %vm1741_vm5, %v1662_v25, %v460_v26 }
 0x1b7   : > { %v1371_v34 = vpop.permute.xlu0 %1370 }
 0x1b8   : > { %v1373_v38 = vunpack.i.h.bf16 %v1371_v34  ;;  %v1372_v39 = vunpack.i.l.bf16 %v1371_v34  ;;  %v1716_v40 = vpop.permute.xlu2 %573 }
 0x1ba   : > { %v500_v43 = vsel %vm499_vm14, %v1368_v37, %v1372_v39  ;;  %v501_v44 = vsel %vm499_vm14, %v1372_v39, %v1373_v38 }
 0x1bb   : > { %v505_v46 = vsel %vm1710_vm15, %v484_v42, %v501_v44 }
 0x1bc   : > { %v641_v47 = vrot.slane %v505_v46, 4 }
 0x1be   : > { %v1732_v49 = vsel %vm689_vm3, %v465_v48, %v641_v47 }
 0x1c0   : > { %v1734_v52 = vpop.permute.xlu2 %1390 }
 0x1c1   : > { %v1393_v37 = vunpack.i.h.bf16 %v1734_v52  ;;  %v1392_v38 = vunpack.i.l.bf16 %v1734_v52 }
 0x1c2   : > { %v1376_v53 = vpop.permute.xlu1 %1375 }
 0x1c3   : > { %v1378_v54 = vunpack.i.h.bf16 %v1376_v53  ;;  %v1377_v20 = vunpack.i.l.bf16 %v1376_v53  ;;  %v559_v50 = vsel %vm558_vm6, %v1392_v38, %v1393_v37 }
 0x1c5   : > { %v483_v56 = vsel %vm482_vm13, %v1378_v54, %v1362_v32  ;;  %v1367_v32 = vunpack.i.l.bf16 %v1706_v29 }
 0x1c6   : > { %v504_v58 = vsel %vm1736_vm4, %v483_v56, %v500_v43 }
 0x1c7   : > { %v640_v59 = vrot.slane %v504_v58, 4 }
 0x1c8   : > { %v557_v60 = vpop.permute.xlu0 %556  ;;  %v591_v63 = vpop.permute.xlu2 %590 }
 0x1c9   : > { %v1752_v62 = vsel %vm689_vm3, %v464_v61, %v640_v59  ;;  %v560_v46 = vsel %vm558_vm6, %v1393_v37, %v557_v60 }
 0x1ca   : > { %v1381_v1 = vpop.permute.xlu1 %1380 }
 0x1cb   : > { %v1383_v27 = vunpack.i.h.bf16 %v1381_v1  ;;  %v1382_v28 = vunpack.i.l.bf16 %v1381_v1 }
 0x1cd   : > { %v520_v39 = vsel %vm499_vm14, %v1382_v28, %v1383_v27  ;;  %v521_v42 = vsel %vm499_vm14, %v1383_v27, %v1367_v32 }
 0x1d0   : > { %v1386_v0 = vpop.permute.xlu0 %1385  ;;  %v593_v2 = vpop.permute.xlu2 %592 }
 0x1d1   : > { %v596_v11 = vsel %vm575_vm7, %v591_v63, %v593_v2  ;;  %v1388_v15 = vunpack.i.h.bf16 %v1386_v0  ;;  %v1387_v17 = vunpack.i.l.bf16 %v1386_v0 }
 0x1d3   : > { %v536_v31 = vsel %vm482_vm13, %v1387_v17, %v1388_v15  ;;  %v537_v33 = vsel %vm482_vm13, %v1388_v15, %v1377_v20 }
 0x1d4   : > { %v540_v43 = vsel %vm1741_vm5, %v520_v39, %v536_v31  ;;  %v541_v44 = vsel %vm1718_vm1, %v521_v42, %v537_v33 }
 0x1d5   : > { %v665_v51 = vrot.slane %v540_v43, 4  ;;  %v666_v56 = vrot.slane %v541_v44, 4 }
 0x1d7   : > { %v1396_v5 = vpop.permute.xlu1 %1395 }
 0x1d8   : > { %v595_v3 = vpop.permute.xlu0 %594  ;;  %v609_v6 = vpop.permute.xlu2 %608  ;;  %v1398_v34 = vunpack.i.h.bf16 %v1396_v5  ;;  %v1397_v36 = vunpack.i.l.bf16 %v1396_v5 }
 0x1d9   : > { %v597_v8 = vsel %vm575_vm7, %v593_v2, %v595_v3 }
 0x1da   : > { %v576_v29 = vsel %vm575_vm7, %v1397_v36, %v1398_v34  ;;  %v577_v45 = vsel %vm575_vm7, %v1398_v34, %v1716_v40 }
 0x1db   : > { %v580_v59 = vsel %vm1736_vm4, %v559_v50, %v576_v29  ;;  %v581_v40 = vsel %vm1710_vm15, %v560_v46, %v577_v45 }
 0x1e0   : > { %v611_v7 = vpop.permute.xlu0 %610  ;;  %v657_v18 = vpop.permute.xlu2 %656 }
 0x1e1   : > { %v613_v9 = vsel %vm558_vm6, %v609_v6, %v611_v7 }
 0x1e2   : > { %v617_v25 = vsel %vm1718_vm1, %v597_v8, %v613_v9 }
 0x1e3   : > { %1317 = vmatpush.msk.msra.mxu1 %vm689_vm3, %v617_v25 }
 0x1e5   : > { %v607_v10 = vpop.permute.xlu1 %606 }
 0x1e6   : > { %v612_v12 = vsel %vm558_vm6, %v607_v10, %v609_v6  ;;  %v1353_v6 = vunpack.i.h.bf16 %v1708_v24 }
 0x1e7   : > { %v616_v13 = vsel %vm1741_vm5, %v596_v11, %v612_v12 }
 0x1e8   : > { %1314 = vmatpush.msk.msra.mxu0 %vm689_vm3, %v616_v13  ;;  %v1401_v47 = vpop.permute.xlu2 %1400 }
 0x1e9   : > { %v1403_v60 = vunpack.i.h.bf16 %v1401_v47  ;;  %v1402_v61 = vunpack.i.l.bf16 %v1401_v47 }
 0x1eb   : > { %v426_v9 = vsel %vm425_vm0, %v1353_v6, %v1402_v61  ;;  %v427_v10 = vsel %vm425_vm0, %v1402_v61, %v1403_v60  ;;  %v1038_v61 = vld [vmem:[%s2025_s5] sm:$0xff] }
 0x1ec   : > { %v435_v13 = vsel %vm1736_vm4, %v426_v9, %v1655_v22  ;;  %v404_v22 = vld [vmem:[%s2022_s2 + $0x8] sm:$0xff] }
 0x1f4   : > { %v708_v21 = vpop.permute.xlu2 %707 }
 0x1f8   : > { %v683_v30 = vpop.permute.xlu1 %682 }
 0x1ff   : > { %v1411_v48 = vpop.permute.xlu0 %1410 }
 0x200   : > { %v1413_v52 = vunpack.i.h.bf16 %v1411_v48  ;;  %v1412_v53 = vunpack.i.l.bf16 %v1411_v48  ;;  %v1406_v54 = vpop.permute.xlu1 %1405 }
 0x201   : > { %v1408_v26 = vunpack.i.h.bf16 %v1406_v54  ;;  %v1407_v58 = vunpack.i.l.bf16 %v1406_v54 }
 0x202   : > { %v685_v63 = vsel %vm684_vm8, %v1412_v53, %v1413_v52  ;;  %v686_v0 = vsel %vm684_vm8, %v1413_v52, %v683_v30 }
 0x203   : > { %v696_v1 = vsel %vm689_vm3, %v580_v59, %v685_v63  ;;  %v697_v2 = vsel %vm689_vm3, %v581_v40, %v686_v0  ;;  %v659_v3 = vsel %vm658_vm9, %v1407_v58, %v1408_v26  ;;  %v660_v5 = vsel %vm658_vm9, %v1408_v26, %v657_v18  ;;  %v1153_v63 = vld [vmem:[%s2026_s6] sm:$0xff]  ;;  %v1154_v0 = vld [vmem:[%s2026_s6 + $0x8] sm:$0xff] }
 0x204   : > { %735 = vmatpush.msra.mxu0 %v696_v1  ;;  %758 = vmatpush.msra.mxu1 %v697_v2  ;;  %v694_v7 = vsel %vm689_vm3, %v659_v3, %v665_v51  ;;  %v695_v8 = vsel %vm689_vm3, %v660_v5, %v666_v56  ;;  %v436_v18 = vsel %vm1710_vm15, %v427_v10, %v1657_v23 }
 0x206   : > { %736 = vmatpush.msra.mxu0 %v694_v7  ;;  %759 = vmatpush.msra.mxu1 %v695_v8 }
 0x207   : > { %v1416_v25 = vpop.permute.xlu0 %1415 }
 0x208   : > { %v1418_v11 = vunpack.i.h.bf16 %v1416_v25  ;;  %v1417_v12 = vunpack.i.l.bf16 %v1416_v25  ;;  %737 = vmatpush.msra.mxu0 %v1752_v62  ;;  %760 = vmatpush.msra.mxu1 %v1732_v49  ;;  %v632_v24 = vpop.permute.xlu1 %631 }
 0x20a   : > { %v635_v15 = vsel %vm2029_vm11, %v1418_v11, %v632_v24  ;;  %v634_v17 = vsel %vm2029_vm11, %v1417_v12, %v1418_v11  ;;  %vm832_vm11 = vcmask 7168  }
 0x20b   : > { %v690_v49 = vsel %vm689_vm3, %v435_v13, %v634_v17  ;;  %v691_v62 = vsel %vm689_vm3, %v436_v18, %v635_v15  ;;  %vm789_vm3 = vcmask 1047688  }
 0x20c   : > { %738 = vmatpush.msra.mxu0 %v690_v49  ;;  %761 = vmatpush.msra.mxu1 %v691_v62 }
 0x20d   : > { %1315 = vmatmul.msk.f32.vlgmr.msra.gmra.mxu0 %vm710_vm12, %v403_v19  ;;  %1318 = vmatmul.msk.f32.vlgmr.msra.gmra.mxu1 %vm710_vm12, %v403_v19 }
 0x20f   : > { %v703_v31 = vpop.permute.xlu0 %702 }
 0x215   : > { %1316 = vmatmul.msk.f32.gmra.mxu0 %vm710_vm12, %v404_v22  ;;  %1319 = vmatmul.msk.f32.gmra.mxu1 %vm710_vm12, %v404_v22  ;;  %vm806_vm12 = vcmask 138248  }
 0x28a   : > { %v740_v23 = vpop.f32.mrf.mxu0  ;;  %v763_v16 = vpop.f32.mrf.mxu1 }
 0x28b   : > { %v764_v32 = vadd.f32 %v763_v16, %v703_v31  ;;  %v741_v33 = vadd.f32 %v740_v23, %v703_v31 }
 0x292   : > { %v743_v27 = vpop.f32.mrf.mxu0  ;;  %v766_v28 = vpop.f32.mrf.mxu1 }
 0x293   : > { %v744_v20 = vadd.f32 %v743_v27, %v708_v21  ;;  %v767_v30 = vadd.f32 %v766_v28, %v708_v21 }
 0x295   : > { %779 = vrot.lane.b32.xlu2 %v767_v30, %s1558_s16  ;;  %777 = vrot.lane.b32.xlu1 %v744_v20, %s1558_s16 }
 0x29d   : > { %773 = vrot.lane.b32.xlu1 %v741_v33, %s1558_s16  ;;  %775 = vrot.lane.b32.xlu2 %v764_v32, %s1558_s16 }
 0x2ef   : > { %v780_v34 = vpop.permute.xlu2 %779 }
 0x2f0   : > { %795 = vst.msk [vmem:[#allocation3 + $0x28] sm:$0xff] %vm359_vm2, %v780_v34 }
 0x2f7   : > { %v812_v36 = vld [vmem:[#allocation3 + $0x28] sm:$0xff]  ;;  %v776_v37 = vpop.permute.xlu2 %775 }
 0x2f8   : > { %823 = vrot.lane.b32.xlu1 %v812_v36, %s1560_s18  ;;  %792 = vst.msk [vmem:[#allocation3 + $0x10] sm:$0xff] %vm359_vm2, %v776_v37 }
 0x2ff   : > { %v810_v29 = vld [vmem:[#allocation3 + $0x10] sm:$0xff] }
 0x307   : > { %v778_v38 = vpop.permute.xlu1 %777 }
 0x308   : > { %v1827_v39 = vsel %vm359_vm2, %v778_v38, %v780_v34  ;;  %793 = vst.msk [vmem:[#allocation3 + $0x18] sm:$0xff] %vm789_vm3, %v778_v38 }
 0x309   : > { %821 = vrot.lane.b32.xlu0 %v1827_v39, %s1560_s18 }
 0x30f   : > { %v774_v42 = vpop.permute.xlu1 %773  ;;  %v797_v43 = vld [vmem:[#allocation3 + $0x18] sm:$0xff] }
 0x310   : > { %v1832_v44 = vsel %vm359_vm2, %v774_v42, %v776_v37  ;;  %790 = vst.msk [vmem:[#allocation3] sm:$0xff] %vm789_vm3, %v774_v42  ;;  %802 = vrot.lane.b32.xlu1 %v797_v43, %s1559_s17  ;;  %vm829_vm2 = vcmask 269448   ;;  %vm835_vm3 = vcmask 277768  }
 0x311   : > { %819 = vrot.lane.b32.xlu0 %v810_v29, %s1560_s18  ;;  %817 = vrot.lane.b32.xlu2 %v1832_v44, %s1560_s18 }
 0x317   : > { %v796_v45 = vld [vmem:[#allocation3] sm:$0xff] }
 0x319   : > { %800 = vrot.lane.b32.xlu2 %v796_v45, %s1559_s17 }
 0x36a   : > { %v824_v48 = vpop.permute.xlu1 %823 }
 0x36b   : > { %v818_v46 = vpop.permute.xlu2 %817 }
 0x373   : > { %v801_v47 = vpop.permute.xlu2 %800 }
 0x374   : > { %807 = vst.msk [vmem:[#allocation3] sm:$0xff] %vm806_vm12, %v801_v47 }
 0x375   : > { %833 = vst.msk [vmem:[#allocation3] sm:$0xff] %vm832_vm11, %v1561_v14 }
 0x37b   : > { %v822_v50 = vpop.permute.xlu0 %821 }
 0x37c   : > { %v826_v51 = vsel %vm394_vm10, %v822_v50, %v824_v48  ;;  %v1845_v56 = vld [vmem:[#allocation3] sm:$0xff] }
 0x37d   : > { %831 = vst.msk [vmem:[#allocation3 + $0x28] sm:$0xff] %vm829_vm2, %v826_v51 }
 0x37e   : > { %837 = vst.msk [vmem:[#allocation3 + $0x28] sm:$0xff] %vm835_vm3, %v1561_v14 }
 0x382   : > { %v803_v52 = vpop.permute.xlu1 %802 }
 0x383   : > { %808 = vst.msk [vmem:[#allocation3 + $0x18] sm:$0xff] %vm806_vm12, %v803_v52  ;;  %v820_v53 = vpop.permute.xlu0 %819  ;;  %vm1237_vm12 = vcmp.lt.s32.totalorder %v323_v4, 256 }
 0x384   : > { %834 = vst.msk [vmem:[#allocation3 + $0x18] sm:$0xff] %vm832_vm11, %v1561_v14  ;;  %v825_v54 = vsel %vm394_vm10, %v818_v46, %v820_v53  ;;  %vm1050_vm10 = vcmask 130048   ;;  %vm1233_vm11 = vcmask 1040384  }
 0x385   : > { %830 = vst.msk [vmem:[#allocation3 + $0x10] sm:$0xff] %vm829_vm2, %v825_v54 }
 0x386   : > { %836 = vst.msk [vmem:[#allocation3 + $0x10] sm:$0xff] %vm835_vm3, %v1561_v14  ;;  %v847_v14 = vld [vmem:[#allocation3 + $0x28] sm:$0xff] }
 0x387   : > { %v1471_v60 = vpack.i.bf16 %v847_v14, %v1827_v39 }
 0x38b   : > { %v1847_v26 = vld [vmem:[#allocation3 + $0x18] sm:$0xff] }
 0x38c   : > { %v1451_v58 = vpack.i.bf16 %v1845_v56, %v1847_v26 }
 0x38d   : > { %v846_v59 = vld [vmem:[#allocation3 + $0x10] sm:$0xff] }
 0x38e   : > { %1452 = vrot.lane.b32.xlu0 %v1451_v58, %s1565_s22  ;;  %v1426_v40 = vpack.i.bf16 %v846_v59, %v1832_v44 }
 0x390   : > { %1427 = vrot.lane.b32.xlu2 %v1426_v40, %s1565_s22  ;;  %1422 = vrot.lane.b32.xlu1 %v1426_v40, %s1567_s24 }
 0x396   : > { %1462 = vrot.lane.b32.xlu0 %v1451_v58, %s1563_s20 }
 0x398   : > { %1437 = vrot.lane.b32.xlu2 %v1426_v40, %s1563_s20  ;;  %1432 = vrot.lane.b32.xlu1 %v1426_v40, %s1559_s17 }
 0x39e   : > { %1472 = vrot.lane.b32.xlu0 %v1471_v60, %s1567_s24 }
 0x3a0   : > { %1442 = vrot.lane.b32.xlu1 %v1426_v40, %s1564_s21  ;;  %1447 = vrot.lane.b32.xlu2 %v1451_v58, %s1567_s24 }
 0x3a6   : > { %1477 = vrot.lane.b32.xlu0 %v1471_v60, %s1565_s22 }
 0x3a8   : > { %1482 = vrot.lane.b32.xlu1 %v1471_v60, %s1559_s17  ;;  %1457 = vrot.lane.b32.xlu2 %v1451_v58, %s1559_s17 }
 0x3ae   : > { %1487 = vrot.lane.b32.xlu0 %v1471_v60, %s1563_s20 }
 0x3b0   : > { %1492 = vrot.lane.b32.xlu1 %v1471_v60, %s1564_s21  ;;  %1467 = vrot.lane.b32.xlu2 %v1451_v58, %s1564_s21 }
 0x3b6   : > { %1517 = vrot.lane.b32.xlu0 %v1471_v60, %s1566_s23 }
 0x3b8   : > { %1497 = vrot.lane.b32.xlu1 %v1426_v40, %s1566_s23  ;;  %1502 = vrot.lane.b32.xlu2 %v1451_v58, %s1566_s23 }
 0x3be   : > { %1522 = vrot.lane.b32.xlu0 %v1471_v60, %s1562_s19 }
 0x3c0   : > { %1507 = vrot.lane.b32.xlu1 %v1426_v40, %s1562_s19  ;;  %1512 = vrot.lane.b32.xlu2 %v1451_v58, %s1562_s19 }
 0x3c6   : > { %1527 = vrot.lane.b32.xlu0 %v1471_v60, %s1568_s25 }
 0x3c8   : > { %1532 = vrot.lane.b32.xlu1 %v1426_v40, %s1568_s25  ;;  %1537 = vrot.lane.b32.xlu2 %v1451_v58, %s1568_s25 }
 0x3ce   : > { %1042 = vperm.xlu0 %1420, %v1038_v61  }
 0x3d0   : > { %1157 = vperm.xlu2 %1419, %v1153_v63  }
 0x3d6   : > { %1162 = vperm.xlu0 %1420, %v1154_v0  }
 0x3ea   : > { %v1428_v1 = vpop.permute.xlu2 %1427 }
 0x3eb   : > { %v1430_v31 = vunpack.i.h.bf16 %v1428_v1  ;;  %v1429_v32 = vunpack.i.l.bf16 %v1428_v1 }
 0x3ed   : > { %v943_v59 = vsel %vm558_vm6, %v1429_v32, %v1430_v31 }
 0x3f2   : > { %v1886_v2 = vpop.permute.xlu2 %1437 }
 0x3fa   : > { %v1448_v6 = vpop.permute.xlu2 %1447 }
 0x3fb   : > { %v1449_v25 = vunpack.i.l.bf16 %v1448_v6  ;;  %v1450_v10 = vunpack.i.h.bf16 %v1448_v6  ;;  %v1440_v6 = vunpack.i.h.bf16 %v1886_v2 }
 0x400   : > { %v1453_v3 = vpop.permute.xlu0 %1452 }
 0x401   : > { %v1455_v34 = vunpack.i.h.bf16 %v1453_v3  ;;  %v1454_v36 = vunpack.i.l.bf16 %v1453_v3 }
 0x402   : > { %v1423_v5 = vpop.permute.xlu1 %1422  ;;  %v1458_v9 = vpop.permute.xlu2 %1457 }
 0x403   : > { %v1425_v12 = vunpack.i.h.bf16 %v1423_v5  ;;  %v1424_v24 = vunpack.i.l.bf16 %v1423_v5  ;;  %v1460_v22 = vunpack.i.h.bf16 %v1458_v9  ;;  %v1459_v28 = vunpack.i.l.bf16 %v1458_v9 }
 0x404   : > { %v942_v58 = vsel %vm558_vm6, %v1455_v34, %v1429_v32 }
 0x405   : > { %v1030_v49 = vsel %vm684_vm8, %v1450_v10, %v1424_v24  ;;  %v1031_v62 = vsel %vm684_vm8, %v1424_v24, %v1425_v12 }
 0x408   : > { %v1888_v7 = vpop.permute.xlu0 %1462 }
 0x409   : > { %v1465_v10 = vunpack.i.h.bf16 %v1888_v7 }
 0x40a   : > { %v1433_v8 = vpop.permute.xlu1 %1432  ;;  %v1468_v23 = vpop.permute.xlu2 %1467 }
 0x40b   : > { %v1435_v16 = vunpack.i.h.bf16 %v1433_v8  ;;  %v1434_v21 = vunpack.i.l.bf16 %v1433_v8  ;;  %v1470_v53 = vunpack.i.h.bf16 %v1468_v23  ;;  %v1469_v54 = vunpack.i.l.bf16 %v1468_v23 }
 0x40c   : > { %v1439_v8 = vunpack.i.l.bf16 %v1886_v2 }
 0x40d   : > { %v962_v42 = vsel %vm575_vm7, %v1460_v22, %v1434_v21  ;;  %v963_v43 = vsel %vm575_vm7, %v1434_v21, %v1435_v16 }
 0x40e   : > { %v970_v61 = vsel %vm1736_vm4, %v942_v58, %v962_v42  ;;  %v974_v63 = vsel %vm1741_vm5, %v962_v42, %v942_v58  ;;  %v971_v3 = vsel %vm1710_vm15, %v943_v59, %v963_v43  ;;  %v975_v5 = vsel %vm1718_vm1, %v963_v43, %v943_v59  ;;  %v1039_v42 = vld [vmem:[%s2025_s5 + $0x8] sm:$0xff] }
 0x40f   : > { %v894_v22 = vsel %vm482_vm13, %v1465_v10, %v1439_v8  ;;  %v895_v23 = vsel %vm482_vm13, %v1439_v8, %v1440_v6  ;;  %1047 = vperm.xlu1 %1541, %v1039_v42  }
 0x410   : > { %v1473_v11 = vpop.permute.xlu0 %1472 }
 0x411   : > { %v1475_v13 = vunpack.i.h.bf16 %v1473_v11  ;;  %v1474_v15 = vunpack.i.l.bf16 %v1473_v11  ;;  %v1464_v11 = vunpack.i.l.bf16 %v1888_v7 }
 0x412   : > { %v1890_v17 = vpop.permute.xlu1 %1442  ;;  %v1503_v9 = vpop.permute.xlu2 %1502 }
 0x413   : > { %v1032_v18 = vsel %vm684_vm8, %v1449_v25, %v1474_v15  ;;  %v1033_v19 = vsel %vm684_vm8, %v1474_v15, %v1475_v13  ;;  %v1445_v40 = vunpack.i.h.bf16 %v1890_v17  ;;  %v1444_v14 = vunpack.i.l.bf16 %v1890_v17 }
 0x414   : > { %1057 = vmatpush.msra.mxu2 %v1032_v18  ;;  %1103 = vmatpush.msra.mxu3 %v1033_v19 }
 0x415   : > { %v914_v13 = vsel %vm499_vm14, %v1470_v53, %v1444_v14  ;;  %v915_v15 = vsel %vm499_vm14, %v1444_v14, %v1445_v40 }
 0x416   : > { %1058 = vmatpush.msra.mxu2 %v1030_v49  ;;  %1104 = vmatpush.msra.mxu3 %v1031_v62  ;;  %v1504_v62 = vunpack.i.l.bf16 %v1503_v9  ;;  %v926_v21 = vsel %vm1741_vm5, %v914_v13, %v894_v22 }
 0x418   : > { %v1478_v27 = vpop.permute.xlu0 %1477 }
 0x419   : > { %v1480_v20 = vunpack.i.h.bf16 %v1478_v27  ;;  %v1479_v30 = vunpack.i.l.bf16 %v1478_v27  ;;  %v927_v27 = vsel %vm1718_vm1, %v915_v15, %v895_v23 }
 0x41a   : > { %v1483_v33 = vpop.permute.xlu1 %1482 }
 0x41b   : > { %v1485_v37 = vunpack.i.h.bf16 %v1483_v33  ;;  %v1484_v38 = vunpack.i.l.bf16 %v1483_v33  ;;  %v944_v29 = vsel %vm558_vm6, %v1454_v36, %v1479_v30  ;;  %v945_v46 = vsel %vm558_vm6, %v1479_v30, %v1480_v20 }
 0x41d   : > { %v964_v45 = vsel %vm575_vm7, %v1459_v28, %v1484_v38  ;;  %v965_v47 = vsel %vm575_vm7, %v1484_v38, %v1485_v37  ;;  %v1505_v28 = vunpack.i.h.bf16 %v1503_v9  ;;  %v839_v37 = vld [vmem:[%s2024_s4 + $0x8] sm:$0xff]  ;;  %v1513_v38 = vpop.permute.xlu2 %1512 }
 0x41e   : > { %v972_v48 = vsel %vm1736_vm4, %v944_v29, %v964_v45  ;;  %v976_v50 = vsel %vm1741_vm5, %v964_v45, %v944_v29  ;;  %v973_v51 = vsel %vm1710_vm15, %v945_v46, %v965_v47  ;;  %v977_v52 = vsel %vm1718_vm1, %v965_v47, %v945_v46 }
 0x41f   : > { %1059 = vmatpush.msra.mxu2 %v972_v48  ;;  %1094 = vmatpush.msrb.mxu1 %v976_v50  ;;  %v1514_v45 = vunpack.i.l.bf16 %v1513_v38  ;;  %v922_v50 = vsel %vm1736_vm4, %v894_v22, %v914_v13 }
 0x420   : > { %v1488_v60 = vpop.permute.xlu0 %1487  ;;  %1105 = vmatpush.msra.mxu3 %v973_v51  ;;  %1140 = vmatpush.msrb.mxu0 %v977_v52  ;;  %v1515_v51 = vunpack.i.h.bf16 %v1513_v38 }
 0x421   : > { %v1490_v0 = vunpack.i.h.bf16 %v1488_v60  ;;  %v1489_v1 = vunpack.i.l.bf16 %v1488_v60  ;;  %1060 = vmatpush.msra.mxu2 %v970_v61  ;;  %1095 = vmatpush.msrb.mxu1 %v974_v63  ;;  %v841_v61 = vld [vmem:[%s2024_s4 + $0x18] sm:$0xff] }
 0x422   : > { %1106 = vmatpush.msra.mxu3 %v971_v3  ;;  %1141 = vmatpush.msrb.mxu0 %v975_v5  ;;  %v1493_v25 = vpop.permute.xlu1 %1492  ;;  %v1183_v5 = vld [vmem:[#allocation4] sm:$0x1] }
 0x423   : > { %v1495_v12 = vunpack.i.h.bf16 %v1493_v25  ;;  %v1494_v24 = vunpack.i.l.bf16 %v1493_v25  ;;  %v896_v17 = vsel %vm482_vm13, %v1464_v11, %v1489_v1  ;;  %v897_v2 = vsel %vm482_vm13, %v1489_v1, %v1490_v0  ;;  %1320 = vmatmul.msk.f32.vlgmr.msrb.gmra.mxu1 %vm1050_vm10, %v839_v37  ;;  %1322 = vmatmul.msk.f32.vlgmr.msrb.gmra.mxu0 %vm1050_vm10, %v839_v37 }
 0x424   : > { %1186 = vperm.xlu1 %1541, %v1183_v5   ;;  %vm2038_vm13 = vcmask 1039360  }
 0x425   : > { %v916_v18 = vsel %vm499_vm14, %v1469_v54, %v1494_v24  ;;  %v917_v19 = vsel %vm499_vm14, %v1494_v24, %v1495_v12  ;;  %v923_v54 = vsel %vm1710_vm15, %v895_v23, %v915_v15  ;;  %v1538_v6 = vpop.permute.xlu2 %1537  ;;  %vm2039_vm14 = vmmov %vm2038_vm13 }
 0x426   : > { %v928_v49 = vsel %vm1741_vm5, %v916_v18, %v896_v17  ;;  %v929_v7 = vsel %vm1718_vm1, %v917_v19, %v897_v2  ;;  %v924_v46 = vsel %vm1736_vm4, %v896_v17, %v916_v18  ;;  %v925_v47 = vsel %vm1710_vm15, %v897_v2, %v917_v19 }
 0x427   : > { %1061 = vmatpush.msra.mxu2 %v928_v49  ;;  %1107 = vmatpush.msra.mxu3 %v929_v7  ;;  %v1539_v25 = vunpack.i.l.bf16 %v1538_v6  ;;  %v1540_v11 = vunpack.i.h.bf16 %v1538_v6  ;;  %v838_v7 = vld [vmem:[%s2024_s4] sm:$0xff] }
 0x428   : > { %v1518_v16 = vpop.permute.xlu0 %1517 }
 0x429   : > { %v1520_v20 = vunpack.i.h.bf16 %v1518_v16  ;;  %v1519_v30 = vunpack.i.l.bf16 %v1518_v16  ;;  %1062 = vmatpush.msra.mxu2 %v926_v21  ;;  %1108 = vmatpush.msra.mxu3 %v927_v27 }
 0x42a   : > { %v1498_v31 = vpop.permute.xlu1 %1497 }
 0x42b   : > { %v1500_v32 = vunpack.i.h.bf16 %v1498_v31  ;;  %v1499_v33 = vunpack.i.l.bf16 %v1498_v31  ;;  %v1012_v34 = vsel %vm658_vm9, %v1504_v62, %v1519_v30  ;;  %v1013_v36 = vsel %vm658_vm9, %v1519_v30, %v1520_v20  ;;  %1321 = vmatmul.msk.f32.gmra.mxu1 %vm1050_vm10, %v841_v61  ;;  %1323 = vmatmul.msk.f32.gmra.mxu0 %vm1050_vm10, %v841_v61 }
 0x42c   : > { %1063 = vmatpush.msra.mxu2 %v1012_v34  ;;  %1109 = vmatpush.msra.mxu3 %v1013_v36 }
 0x42d   : > { %v1010_v43 = vsel %vm658_vm9, %v1505_v28, %v1499_v33  ;;  %v1011_v29 = vsel %vm658_vm9, %v1499_v33, %v1500_v32 }
 0x42e   : > { %1064 = vmatpush.msra.mxu2 %v1010_v43  ;;  %1110 = vmatpush.msra.mxu3 %v1011_v29 }
 0x430   : > { %v1523_v48 = vpop.permute.xlu0 %1522  ;;  %1065 = vmatpush.msra.mxu2 %v924_v46  ;;  %1111 = vmatpush.msra.mxu3 %v925_v47 }
 0x431   : > { %v1525_v52 = vunpack.i.h.bf16 %v1523_v48  ;;  %v1524_v53 = vunpack.i.l.bf16 %v1523_v48 }
 0x432   : > { %v1508_v58 = vpop.permute.xlu1 %1507  ;;  %1066 = vmatpush.msra.mxu2 %v922_v50  ;;  %1112 = vmatpush.msra.mxu3 %v923_v54 }
 0x433   : > { %v1510_v59 = vunpack.i.h.bf16 %v1508_v58  ;;  %v1509_v40 = vunpack.i.l.bf16 %v1508_v58  ;;  %v868_v14 = vsel %vm425_vm0, %v1514_v45, %v1524_v53  ;;  %v869_v60 = vsel %vm425_vm0, %v1524_v53, %v1525_v52  ;;  %v1158_v45 = vpop.permute.xlu2 %1157 }
 0x434   : > { %v880_v63 = vsel %vm1741_vm5, %v1847_v26, %v868_v14  ;;  %v881_v0 = vsel %vm1718_vm1, %v1827_v39, %v869_v60  ;;  %v876_v19 = vsel %vm1736_vm4, %v868_v14, %v1847_v26  ;;  %v877_v49 = vsel %vm1710_vm15, %v869_v60, %v1827_v39  ;;  %v840_v39 = vld [vmem:[%s2024_s4 + $0x10] sm:$0xff] }
 0x435   : > { %1067 = vmatpush.msra.mxu2 %v880_v63  ;;  %1113 = vmatpush.msra.mxu3 %v881_v0  ;;  %v866_v1 = vsel %vm425_vm0, %v1515_v51, %v1509_v40  ;;  %v867_v3 = vsel %vm425_vm0, %v1509_v40, %v1510_v59  ;;  %vm2040_vm0 = vmmov %vm2038_vm13 }
 0x436   : > { %v878_v8 = vsel %vm1741_vm5, %v1845_v56, %v866_v1  ;;  %v879_v9 = vsel %vm1718_vm1, %v1832_v44, %v867_v3  ;;  %vm2041_vm1 = vmmov %vm2040_vm0  ;;  %v874_v62 = vsel %vm1736_vm4, %v866_v1, %v1845_v56  ;;  %v875_v22 = vsel %vm1710_vm15, %v867_v3, %v1832_v44 }
 0x437   : > { %1068 = vmatpush.msra.mxu2 %v878_v8  ;;  %1114 = vmatpush.msra.mxu3 %v879_v9 }
 0x438   : > { %v1528_v10 = vpop.permute.xlu0 %1527 }
 0x439   : > { %v1530_v12 = vunpack.i.h.bf16 %v1528_v10  ;;  %v1529_v24 = vunpack.i.l.bf16 %v1528_v10 }
 0x43a   : > { %v1533_v13 = vpop.permute.xlu1 %1532 }
 0x43b   : > { %v992_v57 = vsel %vm2038_vm13, %v1539_v25, %v1529_v24  ;;  %v993_v15 = vsel %vm2039_vm14, %v1529_v24, %v1530_v12  ;;  %v1535_v17 = vunpack.i.h.bf16 %v1533_v13  ;;  %v1534_v41 = vunpack.i.l.bf16 %v1533_v13 }
 0x43c   : > { %1069 = vmatpush.msra.mxu2 %v992_v57  ;;  %1115 = vmatpush.msra.mxu3 %v993_v15 }
 0x43d   : > { %v990_v18 = vsel %vm2040_vm0, %v1540_v11, %v1534_v41  ;;  %v991_v2 = vsel %vm2041_vm1, %v1534_v41, %v1535_v17 }
 0x43e   : > { %1070 = vmatpush.msra.mxu2 %v990_v18  ;;  %1116 = vmatpush.msra.mxu3 %v991_v2 }
 0x440   : > { %1071 = vmatpush.msra.mxu2 %v876_v19  ;;  %1117 = vmatpush.msra.mxu3 %v877_v49  ;;  %v1043_v55 = vpop.permute.xlu0 %1042 }
 0x442   : > { %1072 = vmatpush.msra.mxu2 %v874_v62  ;;  %1118 = vmatpush.msra.mxu3 %v875_v22 }
 0x443   : > { %1073 = vmatmul.f32.vlgmr.msra.gmra.mxu2 %v838_v7  ;;  %1119 = vmatmul.f32.vlgmr.msra.gmra.mxu3 %v838_v7 }
 0x448   : > { %v1163_v46 = vpop.permute.xlu0 %1162 }
 0x44b   : > { %1076 = vmatmul.f32.gmra.mxu2 %v840_v39  ;;  %1122 = vmatmul.f32.gmra.mxu3 %v840_v39 }
 0x481   : > { %v1048_v28 = vpop.permute.xlu1 %1047 }
 0x496   : > { %v1187_v0 = vpop.permute.xlu1 %1186 }
 0x497   : > { %v1189_v5 = vperm.slane %v1187_v0, 0 }
 0x4a0   : > { %v1097_v26 = vpop.f32.mrf.mxu1  ;;  %v1143_v23 = vpop.f32.mrf.mxu0 }
 0x4a8   : > { %v1100_v20 = vpop.f32.mrf.mxu1  ;;  %v1146_v30 = vpop.f32.mrf.mxu0 }
 0x4c6   : > { %v1074_v16 = vpop.f32.mrf.mxu2  ;;  %v1120_v21 = vpop.f32.mrf.mxu3 }
 0x4c7   : > { %v1075_v56 = vadd.f32 %v1074_v16, %v1043_v55  ;;  %v1121_v27 = vadd.f32 %v1120_v21, %v1043_v55 }
 0x4c9   : > { %v1098_v35 = vadd.f32 %v1097_v26, %v1075_v56  ;;  %v1144_v44 = vadd.f32 %v1143_v23, %v1121_v27 }
 0x4cb   : > { %v1149_v36 = vmax.f32 %v1098_v35, 0.0  ;;  %v1150_v37 = vmax.f32 %v1144_v44, 0.0 }
 0x4cd   : > { %v1165_v47 = vmul.f32 %v1158_v45, %v1149_v36  ;;  %v1166_v48 = vmul.f32 %v1158_v45, %v1150_v37 }
 0x4ce   : > { %v1077_v31 = vpop.f32.mrf.mxu2  ;;  %v1123_v32 = vpop.f32.mrf.mxu3 }
 0x4cf   : > { %v1078_v33 = vadd.f32 %v1077_v31, %v1048_v28  ;;  %v1124_v34 = vadd.f32 %v1123_v32, %v1048_v28 }
 0x4d1   : > { %v1101_v38 = vadd.f32 %v1100_v20, %v1078_v33  ;;  %v1147_v42 = vadd.f32 %v1146_v30, %v1124_v34 }
 0x4d3   : > { %v1151_v43 = vmax.f32 %v1101_v38, 0.0  ;;  %v1152_v29 = vmax.f32 %v1147_v42, 0.0 }
 0x4d5   : > { %v1167_v50 = vmul.f32 %v1163_v46, %v1151_v43  ;;  %v1168_v51 = vmul.f32 %v1163_v46, %v1152_v29 }
 0x4d7   : > { %v1169_v52 = vadd.f32 %v1167_v50, %v1165_v47  ;;  %v1176_v53 = vadd.f32 %v1168_v51, %v1166_v48 }
 0x4d9   : > { %v1170_v54 = vrot.slane %v1169_v52, 4  ;;  %v1177_v58 = vrot.slane %v1176_v53, 4 }
 0x4db   : > { %v1171_v59 = vadd.f32 %v1170_v54, %v1169_v52  ;;  %v1178_v40 = vadd.f32 %v1177_v58, %v1176_v53 }
 0x4dd   : > { %v1172_v14 = vrot.slane %v1171_v59, 2  ;;  %v1179_v60 = vrot.slane %v1178_v40, 2 }
 0x4df   : > { %v1173_v61 = vadd.f32 %v1172_v14, %v1171_v59  ;;  %v1180_v63 = vadd.f32 %v1179_v60, %v1178_v40 }
 0x4e1   : > { %v1174_v1 = vrot.slane %v1173_v61, 1  ;;  %v1181_v3 = vrot.slane %v1180_v63, 1 }
 0x4e3   : > { %v1175_v6 = vadd.f32 %v1174_v1, %v1173_v61  ;;  %v1182_v8 = vadd.f32 %v1181_v3, %v1180_v63 }
 0x4e5   : > { %v1190_v9 = vadd.f32 %v1189_v5, %v1175_v6  ;;  %v1191_v25 = vadd.f32 %v1189_v5, %v1182_v8 }
 0x4e7   : > { %v1324_v10 = vmul.f32 -1.442695, %v1190_v9  ;;  %v1325_v11 = vmul.f32 -1.442695, %v1191_v25 }
 0x4e9   : > { %1542 = vpow2.f32 %v1324_v10 }
 0x4ea   : > { %1544 = vpow2.f32 %v1325_v11 }
 0x4ef   : > { %v1543_v12 = vpop.eup %1542 }
 0x4f0   : > { %v1545_v24 = vpop.eup %1544  ;;  %v1198_v13 = vadd.f32 1.0, %v1543_v12 }
 0x4f1   : > { %v1199_v57 = vadd.f32 1.0, %v1545_v24 }
 0x4f2   : > { %1546 = vrcp.f32 %v1198_v13  ;;  %vm1205_vm5 = vweird.f32 %v1198_v13  ;;  %v1211_v26 = vand.u32 2147483648, %v1198_v13  ;;  %v1209_v16 = vand.u32 2147483647, %v1198_v13 }
 0x4f3   : > { %1548 = vrcp.f32 %v1199_v57  ;;  %v1226_v7 = vand.u32 2147483648, %v1199_v57  ;;  %v1224_v22 = vand.u32 2147483647, %v1199_v57  ;;  %vm1220_vm7 = vweird.f32 %v1199_v57 }
 0x4f4   : > { %v1212_v28 = vor.u32 1.1754944e-38, %v1211_v26  ;;  %vm1210_vm2 = vcmp.eq.f32.partialorder %v1209_v16, 8.507059e+37 }
 0x4f5   : > { %v1227_v55 = vor.u32 1.1754944e-38, %v1226_v7  ;;  %vm1225_vm9 = vcmp.eq.f32.partialorder %v1224_v22, 8.507059e+37 }
 0x4f8   : > { %v1547_v15 = vpop.eup %1546 }
 0x4f9   : > { %v1549_v17 = vpop.eup %1548  ;;  %v1201_v41 = vmul.f32 %v1547_v15, %v1198_v13  ;;  %vm1206_vm15 = vweird.f32 %v1547_v15 }
 0x4fa   : > { %v1216_v18 = vmul.f32 %v1549_v17, %v1199_v57  ;;  %vm1221_vm4 = vweird.f32 %v1549_v17  ;;  %vm2005_vm6 = vmor %vm1205_vm5, %vm1206_vm15 }
 0x4fb   : > { %v1202_v2 = vsub.f32 1.0, %v1201_v41  ;;  %vm1222_vm8 = vmor %vm1220_vm7, %vm1221_vm4 }
 0x4fc   : > { %v1217_v19 = vsub.f32 1.0, %v1216_v18 }
 0x4fd   : > { %v1203_v49 = vmul.f32 %v1547_v15, %v1202_v2 }
 0x4fe   : > { %v1218_v62 = vmul.f32 %v1549_v17, %v1217_v19 }
 0x4ff   : > { %v1204_v39 = vadd.f32 %v1547_v15, %v1203_v49 }
 0x500   : > { %v1219_v21 = vadd.f32 %v1549_v17, %v1218_v62 }
 0x501   : > { %v1208_v56 = vsel %vm2005_vm6, %v1547_v15, %v1204_v39 }
 0x502   : > { %v1223_v27 = vsel %vm1222_vm8, %v1549_v17, %v1219_v21  ;;  %v1213_v20 = vsel %vm1210_vm2, %v1212_v28, %v1208_v56 }
 0x503   : > { %v1228_v35 = vsel %vm1225_vm9, %v1227_v55, %v1223_v27 }
 0x504   : > { %v1232_v44 = vrot.slane %v1228_v35, 7 }
 0x506   : > { %v1234_v30 = vsel %vm1233_vm11, %v1213_v20, %v1232_v44 }
 0x507   : > { %1239 = vst.msk [vmem:[%s322_s12] sm:$0x3] %vm1237_vm12, %v1234_v30 }
 0x508 PF: > { %s20_s29 = sadd.s32 1, %s1556_s29  }
 0x509   : > { %p17_p4 = scmp.ge.s32.totalorder %s20_s29, 4  }
 0x50b   :  { %19 = sbr.rel (!%p17_p4) target bundleno = 3 (0x3), region = 100 }

</bundles_post_ra>
